<compile_context>
chip_gen: v7x
topology: tpu7x:2x2x1
jax: 0.10.0
libtpu: 0.0.40
codegen_flags: <defaults>
</compile_context>

<pallas_src>
import functools
import math

import jax
import jax.numpy as jnp
from jax.experimental import pallas as pl
from jax.experimental.pallas import tpu as pltpu


CFG = dict(vocab=100, type_vocab=2, max_pos=16, hidden=32, heads=2,
           ffn=64, layers=2, num_class=5)
CLS_PAD = 128     # lane-dense padding of the class axis for classifier/CE
LN_EPS = 1e-12


# ----------------------------- fused Pallas kernel -----------------------------

def _ln(x, g, b, eps):
    mu = jnp.mean(x, axis=-1, keepdims=True)
    var = jnp.mean(jnp.square(x - mu), axis=-1, keepdims=True)
    return (x - mu) * jax.lax.rsqrt(var + eps) * g + b


def _fused_kernel(*refs, num_layers, num_heads, head_dim, eps, with_loss):
    if with_loss:
        (emb_ref, bias_ref, sel_ref, tgt_ref,
         egln_g_ref, egln_b_ref,
         wqkv_ref, bqkv_ref, wo_ref, bo_ref, ln1g_ref, ln1b_ref,
         w1_ref, b1_ref, w2_ref, b2_ref, ln2g_ref, ln2b_ref,
         clsw_ref, clsb_ref,
         logits_ref, loss_ref, valid_ref) = refs
    else:
        (emb_ref, bias_ref, sel_ref,
         egln_g_ref, egln_b_ref,
         wqkv_ref, bqkv_ref, wo_ref, bo_ref, ln1g_ref, ln1b_ref,
         w1_ref, b1_ref, w2_ref, b2_ref, ln2g_ref, ln2b_ref,
         clsw_ref, clsb_ref,
         logits_ref) = refs
        tgt_ref = loss_ref = valid_ref = None

    H = num_heads * head_dim
    BS = emb_ref.shape[0]

    # --- embedding LayerNorm (fused; no separate launch / HBM round trip) ---
    x = _ln(emb_ref[...].astype(jnp.float32), egln_g_ref[...], egln_b_ref[...], eps)
    bias = bias_ref[...]                                   # (BS, BS) block-diag additive

    # --- encoder layers; weights stacked on leading L axis, static unroll ---
    for l in range(num_layers):
        xb = x.astype(jnp.bfloat16)
        # fused QKV projection (scale already folded into Q columns at init)
        qkv = jnp.dot(xb, wqkv_ref[l],
                      preferred_element_type=jnp.float32) + bqkv_ref[l]   # (BS, 3H)
        qkvb = qkv.astype(jnp.bfloat16)                    # one bf16 cast for all heads
        wo_l = wo_ref[l]                                   # (H, H) bf16

        attn = jnp.zeros((BS, H), jnp.float32)
        for h in range(num_heads):
            lo = h * head_dim
            q = qkvb[:, lo:lo + head_dim]
            k = qkvb[:, H + lo:H + lo + head_dim]
            v = qkvb[:, 2 * H + lo:2 * H + lo + head_dim]
            # q @ k^T via last-dim contraction (no transpose materialized)
            s = jax.lax.dot_general(q, k, (((1,), (1,)), ((), ())),
                                    preferred_element_type=jnp.float32)   # (BS, BS)
            s = s + bias
            s = s - jnp.max(s, axis=-1, keepdims=True)
            p = jnp.exp(s)
            p = p * pl.reciprocal(jnp.sum(p, axis=-1, keepdims=True), approx=True)
            ctx = jnp.dot(p.astype(jnp.bfloat16), v,
                          preferred_element_type=jnp.float32)             # (BS, hd)
            # accumulate output projection per head (sublane-aligned wo row slice)
            attn = attn + jnp.dot(ctx.astype(jnp.bfloat16),
                                  wo_l[lo:lo + head_dim, :],
                                  preferred_element_type=jnp.float32)
        attn = attn + bo_ref[l]
        x = _ln(x + attn, ln1g_ref[l], ln1b_ref[l], eps)

        # --- FFN (GELU) + residual + LN2 ---
        # TODO(synk): HF BERT uses exact erf-GELU; tanh-approx GELU used here.
        ff = jnp.dot(x.astype(jnp.bfloat16), w1_ref[l],
                     preferred_element_type=jnp.float32) + b1_ref[l]
        ff = jax.nn.gelu(ff, approximate=True)
        ff = jnp.dot(ff.astype(jnp.bfloat16), w2_ref[l],
                     preferred_element_type=jnp.float32) + b2_ref[l]
        x = _ln(x + ff, ln2g_ref[l], ln2b_ref[l], eps)

    # --- in-kernel sent_pos gather via one-hot selection matmul ---
    gathered = jnp.dot(sel_ref[...], x.astype(jnp.bfloat16),
                       preferred_element_type=jnp.float32)                # (BP, H)

    # --- classifier (lane-dense padded class axis) ---
    logits = jnp.dot(gathered.astype(jnp.bfloat16), clsw_ref[...],
                     preferred_element_type=jnp.float32) + clsb_ref[...]  # (BP, CLS_PAD)
    logits_ref[...] = logits

    if with_loss:
        tgt = tgt_ref[...]                                 # (BP, 1) int32
        m = jnp.max(logits, axis=-1, keepdims=True)
        lse = jnp.log(jnp.sum(jnp.exp(logits - m), axis=-1, keepdims=True)) + m
        cls = jax.lax.broadcasted_iota(jnp.int32, logits.shape, 1)
        picked = jnp.sum(jnp.where(cls == tgt, logits, 0.0), axis=-1, keepdims=True)
        valid = (tgt != -100).astype(jnp.float32)          # ignore_index=-100
        # in-kernel reduction to scalars (no JAX-side reduces)
        loss_ref[...] = jnp.sum((lse - picked) * valid, axis=0, keepdims=True)
        valid_ref[...] = jnp.sum(valid, axis=0, keepdims=True)


# ----------------------------- Model (glue) -----------------------------

def init_params(key, cfg):
    H, FF, C, L = cfg["hidden"], cfg["ffn"], cfg["num_class"], cfg["layers"]
    hd = H // cfg["heads"]
    scale = 1.0 / math.sqrt(hd)
    ks = iter(jax.random.split(key, 16 + 4 * L))
    std = 0.02

    def w(k, din, dout):
        return jax.random.normal(k, (din, dout), jnp.float32) * std

    params = {
        "word_emb": w(next(ks), cfg["vocab"], H),
        "pos_emb": w(next(ks), cfg["max_pos"], H),
        "type_emb": w(next(ks), cfg["type_vocab"], H),
        "emb_ln_g": jnp.ones((1, H), jnp.float32),
        "emb_ln_b": jnp.zeros((1, H), jnp.float32),
    }

    wqkv_l, bqkv_l, wo_l, bo_l = [], [], [], []
    w1_l, b1_l, w2_l, b2_l = [], [], [], []
    ln1g_l, ln1b_l, ln2g_l, ln2b_l = [], [], [], []
    for _ in range(L):
        # fold 1/sqrt(head_dim) into the Q columns of wqkv / bqkv at init
        wqkv_l.append(w(next(ks), H, 3 * H).at[:, :H].multiply(scale))
        bqkv_l.append(jnp.zeros((1, 3 * H), jnp.float32).at[:, :H].multiply(scale))
        wo_l.append(w(next(ks), H, H)); bo_l.append(jnp.zeros((1, H), jnp.float32))
        w1_l.append(w(next(ks), H, FF)); b1_l.append(jnp.zeros((1, FF), jnp.float32))
        w2_l.append(w(next(ks), FF, H)); b2_l.append(jnp.zeros((1, H), jnp.float32))
        ln1g_l.append(jnp.ones((1, H), jnp.float32))
        ln1b_l.append(jnp.zeros((1, H), jnp.float32))
        ln2g_l.append(jnp.ones((1, H), jnp.float32))
        ln2b_l.append(jnp.zeros((1, H), jnp.float32))

    stack = lambda lst, dt=None: (jnp.stack(lst).astype(dt) if dt else jnp.stack(lst))
    params.update(
        wqkv=stack(wqkv_l, jnp.bfloat16), bqkv=stack(bqkv_l),
        wo=stack(wo_l, jnp.bfloat16), bo=stack(bo_l),
        w1=stack(w1_l, jnp.bfloat16), b1=stack(b1_l),
        w2=stack(w2_l, jnp.bfloat16), b2=stack(b2_l),
        ln1_g=stack(ln1g_l), ln1_b=stack(ln1b_l),
        ln2_g=stack(ln2g_l), ln2_b=stack(ln2b_l))

    # classifier weights padded to CLS_PAD lanes; padded bias columns get -1e30
    # so they never influence softmax/CE; sliced off for the returned logits.
    cls_w = w(next(ks), H, C).astype(jnp.bfloat16)
    params["cls_w_pad"] = jnp.zeros((H, CLS_PAD), jnp.bfloat16).at[:, :C].set(cls_w)
    params["cls_b_pad"] = jnp.full((1, CLS_PAD), -1e30, jnp.float32).at[:, :C].set(0.0)
    return params


def ner_bert_classifier(params, input_ids, token_type_ids, attention_mask,
                        sent_pos, target=None, cfg=CFG):
    B, S = input_ids.shape
    H, C = cfg["hidden"], cfg["num_class"]
    P = sent_pos.shape[1]
    with_loss = target is not None

    # embedding lookups stay in plain JAX (tiny XLA gathers); everything after
    # them runs inside the single fused kernel.
    emb = (params["word_emb"][input_ids]
           + params["pos_emb"][jnp.arange(S)][None, :, :]
           + params["type_emb"][token_type_ids]).reshape(B * S, H)

    # block-diagonal additive attention bias over the flattened token axis:
    # same-batch AND unmasked key -> 0, else -10000 (matches BERT's extended mask;
    # cross-batch entries vanish under softmax).
    batch_ids = jnp.repeat(jnp.arange(B), S)
    same_batch = batch_ids[:, None] == batch_ids[None, :]
    key_ok = (attention_mask.reshape(B * S) > 0)[None, :]
    bias = jnp.where(same_batch & key_ok, 0.0, -10000.0).astype(jnp.float32)

    # one-hot selection matrix for the in-kernel sent_pos gather
    rows = (jnp.arange(B)[:, None] * S + sent_pos).reshape(B * P)
    sel = (rows[:, None] == jnp.arange(B * S)[None, :]).astype(jnp.bfloat16)

    args = [emb, bias, sel]
    if with_loss:
        args.append(target.reshape(B * P, 1).astype(jnp.int32))
    args += [params["emb_ln_g"], params["emb_ln_b"],
             params["wqkv"], params["bqkv"], params["wo"], params["bo"],
             params["ln1_g"], params["ln1_b"],
             params["w1"], params["b1"], params["w2"], params["b2"],
             params["ln2_g"], params["ln2_b"],
             params["cls_w_pad"], params["cls_b_pad"]]

    kernel = functools.partial(
        _fused_kernel, num_layers=cfg["layers"], num_heads=cfg["heads"],
        head_dim=H // cfg["heads"], eps=LN_EPS, with_loss=with_loss)

    if with_loss:
        out_shape = (jax.ShapeDtypeStruct((B * P, CLS_PAD), jnp.float32),
                     jax.ShapeDtypeStruct((1, 1), jnp.float32),
                     jax.ShapeDtypeStruct((1, 1), jnp.float32))
        logits_pad, loss_sum, valid_sum = pl.pallas_call(
            kernel, out_shape=out_shape)(*args)
        logits = logits_pad[:, :C].reshape(B, P, C)
        # mean over non-ignored tokens; all-ignored gives NaN, matching torch CE.
        loss = loss_sum[0, 0] / valid_sum[0, 0]
        return logits, loss

    logits_pad = pl.pallas_call(
        kernel, out_shape=jax.ShapeDtypeStruct((B * P, CLS_PAD), jnp.float32))(*args)
    return logits_pad[:, :C].reshape(B, P, C)


# ----------------------------- Main -----------------------------

if __name__ == "__main__":
    key = jax.random.PRNGKey(0)
    k_param, k_ids, k_mask, k_pos, k_tgt = jax.random.split(key, 5)

    B, S, P = 2, CFG["max_pos"], 8
    params = init_params(k_param, CFG)

    input_ids = jax.random.randint(k_ids, (B, S), 0, CFG["vocab"], dtype=jnp.int32)
    token_type_ids = jnp.zeros((B, S), jnp.int32)
    attention_mask = jnp.ones((B, S), jnp.int32).at[:, S - 3:].set(0)
    sent_pos = jax.random.randint(k_pos, (B, P), 0, S, dtype=jnp.int32)
    target = jax.random.randint(k_tgt, (B, P), 0, CFG["num_class"], dtype=jnp.int32)
    target = target.at[0, 0].set(-100).at[1, P - 1].set(-100)   # ignore_index demo

    fwd_infer = jax.jit(lambda p, ii, tt, am, sp:
                        ner_bert_classifier(p, ii, tt, am, sp))
    fwd_train = jax.jit(lambda p, ii, tt, am, sp, tg:
                        ner_bert_classifier(p, ii, tt, am, sp, tg))

    logits_only = fwd_infer(params, input_ids, token_type_ids, attention_mask, sent_pos)
    logits, loss = fwd_train(params, input_ids, token_type_ids, attention_mask,
                             sent_pos, target)
    jax.block_until_ready((logits_only, logits, loss))

    assert logits_only.shape == (B, P, CFG["num_class"])
    assert logits.shape == (B, P, CFG["num_class"])
    assert jnp.isfinite(loss)
    assert bool(jnp.all(jnp.isfinite(logits)))
    print("KERNEL_OK")
</pallas_src>

<mosaic_0001>
module attributes {stable_mosaic.version = 11 : i64} {
  func.func @_fused_kernel(%arg0: memref<32x32xf32, #tpu.memory_space<vmem>>, %arg1: memref<32x32xf32, #tpu.memory_space<vmem>>, %arg2: memref<16x32xbf16, #tpu.memory_space<vmem>>, %arg3: memref<1x32xf32, #tpu.memory_space<vmem>>, %arg4: memref<1x32xf32, #tpu.memory_space<vmem>>, %arg5: memref<2x32x96xbf16, #tpu.memory_space<vmem>>, %arg6: memref<2x1x96xf32, #tpu.memory_space<vmem>>, %arg7: memref<2x32x32xbf16, #tpu.memory_space<vmem>>, %arg8: memref<2x1x32xf32, #tpu.memory_space<vmem>>, %arg9: memref<2x1x32xf32, #tpu.memory_space<vmem>>, %arg10: memref<2x1x32xf32, #tpu.memory_space<vmem>>, %arg11: memref<2x32x64xbf16, #tpu.memory_space<vmem>>, %arg12: memref<2x1x64xf32, #tpu.memory_space<vmem>>, %arg13: memref<2x64x32xbf16, #tpu.memory_space<vmem>>, %arg14: memref<2x1x32xf32, #tpu.memory_space<vmem>>, %arg15: memref<2x1x32xf32, #tpu.memory_space<vmem>>, %arg16: memref<2x1x32xf32, #tpu.memory_space<vmem>>, %arg17: memref<32x128xbf16, #tpu.memory_space<vmem>>, %arg18: memref<1x128xf32, #tpu.memory_space<vmem>>, %arg19: memref<16x128xf32, #tpu.memory_space<vmem>>) attributes {dimension_semantics = [], scalar_prefetch = 0 : i64, scratch_operands = 0 : i64, tpu.core_type = #tpu.core_type<tc>} {
    %c0 = arith.constant 0 : index
    %c0_0 = arith.constant 0 : index
    %0 = vector.load %arg0[%c0, %c0_0] : memref<32x32xf32, #tpu.memory_space<vmem>>, vector<32x32xf32>
    %c0_1 = arith.constant 0 : index
    %c0_2 = arith.constant 0 : index
    %1 = vector.load %arg3[%c0_1, %c0_2] : memref<1x32xf32, #tpu.memory_space<vmem>>, vector<1x32xf32>
    %c0_3 = arith.constant 0 : index
    %c0_4 = arith.constant 0 : index
    %2 = vector.load %arg4[%c0_3, %c0_4] : memref<1x32xf32, #tpu.memory_space<vmem>>, vector<1x32xf32>
    %cst = arith.constant dense<0.000000e+00> : vector<32xf32>
    %3 = vector.multi_reduction <add>, %0, %cst [1] : vector<32x32xf32> to vector<32xf32>
    %4 = vector.shape_cast %3 : vector<32xf32> to vector<32x1xf32>
    %cst_5 = arith.constant 3.200000e+01 : f32
    %5 = vector.broadcast %cst_5 : f32 to vector<32x1xf32>
    %6 = arith.divf %4, %5 : vector<32x1xf32>
    %7 = vector.broadcast %6 : vector<32x1xf32> to vector<32x32xf32>
    %8 = arith.subf %0, %7 : vector<32x32xf32>
    %9 = arith.mulf %8, %8 : vector<32x32xf32>
    %cst_6 = arith.constant dense<0.000000e+00> : vector<32xf32>
    %10 = vector.multi_reduction <add>, %9, %cst_6 [1] : vector<32x32xf32> to vector<32xf32>
    %11 = vector.shape_cast %10 : vector<32xf32> to vector<32x1xf32>
    %cst_7 = arith.constant 3.200000e+01 : f32
    %12 = vector.broadcast %cst_7 : f32 to vector<32x1xf32>
    %13 = arith.divf %11, %12 : vector<32x1xf32>
    %14 = vector.broadcast %6 : vector<32x1xf32> to vector<32x32xf32>
    %15 = arith.subf %0, %14 : vector<32x32xf32>
    %cst_8 = arith.constant 9.99999996E-13 : f32
    %16 = vector.broadcast %cst_8 : f32 to vector<32x1xf32>
    %17 = arith.addf %13, %16 : vector<32x1xf32>
    %18 = math.rsqrt %17 : vector<32x1xf32>
    %19 = vector.broadcast %18 : vector<32x1xf32> to vector<32x32xf32>
    %20 = arith.mulf %15, %19 : vector<32x32xf32>
    %21 = vector.broadcast %1 : vector<1x32xf32> to vector<32x32xf32>
    %22 = arith.mulf %20, %21 : vector<32x32xf32>
    %23 = vector.broadcast %2 : vector<1x32xf32> to vector<32x32xf32>
    %24 = arith.addf %22, %23 : vector<32x32xf32>
    %c0_9 = arith.constant 0 : index
    %c0_10 = arith.constant 0 : index
    %25 = vector.load %arg1[%c0_9, %c0_10] : memref<32x32xf32, #tpu.memory_space<vmem>>, vector<32x32xf32>
    %26 = arith.truncf %24 : vector<32x32xf32> to vector<32x32xbf16>
    %c0_11 = arith.constant 0 : index
    %c0_12 = arith.constant 0 : index
    %c0_13 = arith.constant 0 : index
    %27 = vector.load %arg5[%c0_11, %c0_12, %c0_13] : memref<2x32x96xbf16, #tpu.memory_space<vmem>>, vector<1x32x96xbf16>
    %28 = vector.shape_cast %27 : vector<1x32x96xbf16> to vector<32x96xbf16>
    %cst_14 = arith.constant dense<0.000000e+00> : vector<32x96xf32>
    %29 = tpu.matmul %26, %28, %cst_14 {dimension_numbers = #tpu.dot_dimension_numbers<[1], [0], [0], [1], [0, 0, 1, 1], [], []>} : vector<32x32xbf16>, vector<32x96xbf16>, vector<32x96xf32> -> vector<32x96xf32>
    %c0_15 = arith.constant 0 : index
    %c0_16 = arith.constant 0 : index
    %c0_17 = arith.constant 0 : index
    %30 = vector.load %arg6[%c0_15, %c0_16, %c0_17] : memref<2x1x96xf32, #tpu.memory_space<vmem>>, vector<1x1x96xf32>
    %31 = vector.shape_cast %30 : vector<1x1x96xf32> to vector<1x96xf32>
    %32 = vector.broadcast %31 : vector<1x96xf32> to vector<32x96xf32>
    %33 = arith.addf %29, %32 : vector<32x96xf32>
    %34 = arith.truncf %33 : vector<32x96xf32> to vector<32x96xbf16>
    %c0_18 = arith.constant 0 : index
    %c0_19 = arith.constant 0 : index
    %c0_20 = arith.constant 0 : index
    %35 = vector.load %arg7[%c0_18, %c0_19, %c0_20] : memref<2x32x32xbf16, #tpu.memory_space<vmem>>, vector<1x32x32xbf16>
    %36 = vector.shape_cast %35 : vector<1x32x32xbf16> to vector<32x32xbf16>
    %cst_21 = arith.constant 0.000000e+00 : f32
    %37 = vector.broadcast %cst_21 : f32 to vector<32x32xf32>
    %38 = vector.extract_strided_slice %34 {offsets = [0, 0], sizes = [32, 16], strides = [1, 1]} : vector<32x96xbf16> to vector<32x16xbf16>
    %39 = vector.extract_strided_slice %34 {offsets = [0, 32], sizes = [32, 16], strides = [1, 1]} : vector<32x96xbf16> to vector<32x16xbf16>
    %40 = vector.extract_strided_slice %34 {offsets = [0, 64], sizes = [32, 16], strides = [1, 1]} : vector<32x96xbf16> to vector<32x16xbf16>
    %cst_22 = arith.constant dense<0.000000e+00> : vector<32x32xf32>
    %41 = tpu.matmul %38, %39, %cst_22 {dimension_numbers = #tpu.dot_dimension_numbers<[1], [1], [0], [0], [0, 0, 1, 0], [], []>} : vector<32x16xbf16>, vector<32x16xbf16>, vector<32x32xf32> -> vector<32x32xf32>
    %42 = arith.addf %41, %25 : vector<32x32xf32>
    %cst_23 = arith.constant dense<0xFF800000> : vector<32xf32>
    %43 = vector.multi_reduction <maximumf>, %42, %cst_23 [1] : vector<32x32xf32> to vector<32xf32>
    %44 = vector.shape_cast %43 : vector<32xf32> to vector<32x1xf32>
    %45 = vector.broadcast %44 : vector<32x1xf32> to vector<32x32xf32>
    %46 = arith.subf %42, %45 : vector<32x32xf32>
    %47 = math.exp %46 : vector<32x32xf32>
    %cst_24 = arith.constant dense<0.000000e+00> : vector<32xf32>
    %48 = vector.multi_reduction <add>, %47, %cst_24 [1] : vector<32x32xf32> to vector<32xf32>
    %49 = vector.shape_cast %48 : vector<32xf32> to vector<32x1xf32>
    %50 = tpu.reciprocal %49 {approx = true} : vector<32x1xf32> -> vector<32x1xf32>
    %51 = vector.broadcast %50 : vector<32x1xf32> to vector<32x32xf32>
    %52 = arith.mulf %47, %51 : vector<32x32xf32>
    %53 = arith.truncf %52 : vector<32x32xf32> to vector<32x32xbf16>
    %cst_25 = arith.constant dense<0.000000e+00> : vector<32x16xf32>
    %54 = tpu.matmul %53, %40, %cst_25 {dimension_numbers = #tpu.dot_dimension_numbers<[1], [0], [0], [1], [0, 0, 1, 1], [], []>} : vector<32x32xbf16>, vector<32x16xbf16>, vector<32x16xf32> -> vector<32x16xf32>
    %55 = arith.truncf %54 : vector<32x16xf32> to vector<32x16xbf16>
    %56 = vector.extract_strided_slice %36 {offsets = [0, 0], sizes = [16, 32], strides = [1, 1]} : vector<32x32xbf16> to vector<16x32xbf16>
    %cst_26 = arith.constant dense<0.000000e+00> : vector<32x32xf32>
    %57 = tpu.matmul %55, %56, %cst_26 {dimension_numbers = #tpu.dot_dimension_numbers<[1], [0], [0], [1], [0, 0, 1, 1], [], []>} : vector<32x16xbf16>, vector<16x32xbf16>, vector<32x32xf32> -> vector<32x32xf32>
    %58 = arith.addf %37, %57 : vector<32x32xf32>
    %59 = vector.extract_strided_slice %34 {offsets = [0, 16], sizes = [32, 16], strides = [1, 1]} : vector<32x96xbf16> to vector<32x16xbf16>
    %60 = vector.extract_strided_slice %34 {offsets = [0, 48], sizes = [32, 16], strides = [1, 1]} : vector<32x96xbf16> to vector<32x16xbf16>
    %61 = vector.extract_strided_slice %34 {offsets = [0, 80], sizes = [32, 16], strides = [1, 1]} : vector<32x96xbf16> to vector<32x16xbf16>
    %cst_27 = arith.constant dense<0.000000e+00> : vector<32x32xf32>
    %62 = tpu.matmul %59, %60, %cst_27 {dimension_numbers = #tpu.dot_dimension_numbers<[1], [1], [0], [0], [0, 0, 1, 0], [], []>} : vector<32x16xbf16>, vector<32x16xbf16>, vector<32x32xf32> -> vector<32x32xf32>
    %63 = arith.addf %62, %25 : vector<32x32xf32>
    %cst_28 = arith.constant dense<0xFF800000> : vector<32xf32>
    %64 = vector.multi_reduction <maximumf>, %63, %cst_28 [1] : vector<32x32xf32> to vector<32xf32>
    %65 = vector.shape_cast %64 : vector<32xf32> to vector<32x1xf32>
    %66 = vector.broadcast %65 : vector<32x1xf32> to vector<32x32xf32>
    %67 = arith.subf %63, %66 : vector<32x32xf32>
    %68 = math.exp %67 : vector<32x32xf32>
    %cst_29 = arith.constant dense<0.000000e+00> : vector<32xf32>
    %69 = vector.multi_reduction <add>, %68, %cst_29 [1] : vector<32x32xf32> to vector<32xf32>
    %70 = vector.shape_cast %69 : vector<32xf32> to vector<32x1xf32>
    %71 = tpu.reciprocal %70 {approx = true} : vector<32x1xf32> -> vector<32x1xf32>
    %72 = vector.broadcast %71 : vector<32x1xf32> to vector<32x32xf32>
    %73 = arith.mulf %68, %72 : vector<32x32xf32>
    %74 = arith.truncf %73 : vector<32x32xf32> to vector<32x32xbf16>
    %cst_30 = arith.constant dense<0.000000e+00> : vector<32x16xf32>
    %75 = tpu.matmul %74, %61, %cst_30 {dimension_numbers = #tpu.dot_dimension_numbers<[1], [0], [0], [1], [0, 0, 1, 1], [], []>} : vector<32x32xbf16>, vector<32x16xbf16>, vector<32x16xf32> -> vector<32x16xf32>
    %76 = arith.truncf %75 : vector<32x16xf32> to vector<32x16xbf16>
    %77 = vector.extract_strided_slice %36 {offsets = [16, 0], sizes = [16, 32], strides = [1, 1]} : vector<32x32xbf16> to vector<16x32xbf16>
    %cst_31 = arith.constant dense<0.000000e+00> : vector<32x32xf32>
    %78 = tpu.matmul %76, %77, %cst_31 {dimension_numbers = #tpu.dot_dimension_numbers<[1], [0], [0], [1], [0, 0, 1, 1], [], []>} : vector<32x16xbf16>, vector<16x32xbf16>, vector<32x32xf32> -> vector<32x32xf32>
    %79 = arith.addf %58, %78 : vector<32x32xf32>
    %c0_32 = arith.constant 0 : index
    %c0_33 = arith.constant 0 : index
    %c0_34 = arith.constant 0 : index
    %80 = vector.load %arg8[%c0_32, %c0_33, %c0_34] : memref<2x1x32xf32, #tpu.memory_space<vmem>>, vector<1x1x32xf32>
    %81 = vector.shape_cast %80 : vector<1x1x32xf32> to vector<1x32xf32>
    %82 = vector.broadcast %81 : vector<1x32xf32> to vector<32x32xf32>
    %83 = arith.addf %79, %82 : vector<32x32xf32>
    %84 = arith.addf %24, %83 : vector<32x32xf32>
    %c0_35 = arith.constant 0 : index
    %c0_36 = arith.constant 0 : index
    %c0_37 = arith.constant 0 : index
    %85 = vector.load %arg9[%c0_35, %c0_36, %c0_37] : memref<2x1x32xf32, #tpu.memory_space<vmem>>, vector<1x1x32xf32>
    %86 = vector.shape_cast %85 : vector<1x1x32xf32> to vector<1x32xf32>
    %c0_38 = arith.constant 0 : index
    %c0_39 = arith.constant 0 : index
    %c0_40 = arith.constant 0 : index
    %87 = vector.load %arg10[%c0_38, %c0_39, %c0_40] : memref<2x1x32xf32, #tpu.memory_space<vmem>>, vector<1x1x32xf32>
    %88 = vector.shape_cast %87 : vector<1x1x32xf32> to vector<1x32xf32>
    %cst_41 = arith.constant dense<0.000000e+00> : vector<32xf32>
    %89 = vector.multi_reduction <add>, %84, %cst_41 [1] : vector<32x32xf32> to vector<32xf32>
    %90 = vector.shape_cast %89 : vector<32xf32> to vector<32x1xf32>
    %cst_42 = arith.constant 3.200000e+01 : f32
    %91 = vector.broadcast %cst_42 : f32 to vector<32x1xf32>
    %92 = arith.divf %90, %91 : vector<32x1xf32>
    %93 = vector.broadcast %92 : vector<32x1xf32> to vector<32x32xf32>
    %94 = arith.subf %84, %93 : vector<32x32xf32>
    %95 = arith.mulf %94, %94 : vector<32x32xf32>
    %cst_43 = arith.constant dense<0.000000e+00> : vector<32xf32>
    %96 = vector.multi_reduction <add>, %95, %cst_43 [1] : vector<32x32xf32> to vector<32xf32>
    %97 = vector.shape_cast %96 : vector<32xf32> to vector<32x1xf32>
    %cst_44 = arith.constant 3.200000e+01 : f32
    %98 = vector.broadcast %cst_44 : f32 to vector<32x1xf32>
    %99 = arith.divf %97, %98 : vector<32x1xf32>
    %100 = vector.broadcast %92 : vector<32x1xf32> to vector<32x32xf32>
    %101 = arith.subf %84, %100 : vector<32x32xf32>
    %cst_45 = arith.constant 9.99999996E-13 : f32
    %102 = vector.broadcast %cst_45 : f32 to vector<32x1xf32>
    %103 = arith.addf %99, %102 : vector<32x1xf32>
    %104 = math.rsqrt %103 : vector<32x1xf32>
    %105 = vector.broadcast %104 : vector<32x1xf32> to vector<32x32xf32>
    %106 = arith.mulf %101, %105 : vector<32x32xf32>
    %107 = vector.broadcast %86 : vector<1x32xf32> to vector<32x32xf32>
    %108 = arith.mulf %106, %107 : vector<32x32xf32>
    %109 = vector.broadcast %88 : vector<1x32xf32> to vector<32x32xf32>
    %110 = arith.addf %108, %109 : vector<32x32xf32>
    %111 = arith.truncf %110 : vector<32x32xf32> to vector<32x32xbf16>
    %c0_46 = arith.constant 0 : index
    %c0_47 = arith.constant 0 : index
    %c0_48 = arith.constant 0 : index
    %112 = vector.load %arg11[%c0_46, %c0_47, %c0_48] : memref<2x32x64xbf16, #tpu.memory_space<vmem>>, vector<1x32x64xbf16>
    %113 = vector.shape_cast %112 : vector<1x32x64xbf16> to vector<32x64xbf16>
    %cst_49 = arith.constant dense<0.000000e+00> : vector<32x64xf32>
    %114 = tpu.matmul %111, %113, %cst_49 {dimension_numbers = #tpu.dot_dimension_numbers<[1], [0], [0], [1], [0, 0, 1, 1], [], []>} : vector<32x32xbf16>, vector<32x64xbf16>, vector<32x64xf32> -> vector<32x64xf32>
    %c0_50 = arith.constant 0 : index
    %c0_51 = arith.constant 0 : index
    %c0_52 = arith.constant 0 : index
    %115 = vector.load %arg12[%c0_50, %c0_51, %c0_52] : memref<2x1x64xf32, #tpu.memory_space<vmem>>, vector<1x1x64xf32>
    %116 = vector.shape_cast %115 : vector<1x1x64xf32> to vector<1x64xf32>
    %117 = vector.broadcast %116 : vector<1x64xf32> to vector<32x64xf32>
    %118 = arith.addf %114, %117 : vector<32x64xf32>
    %119 = arith.mulf %118, %118 : vector<32x64xf32>
    %120 = arith.mulf %118, %119 : vector<32x64xf32>
    %cst_53 = arith.constant 4.471500e-02 : f32
    %121 = vector.broadcast %cst_53 : f32 to vector<32x64xf32>
    %122 = arith.mulf %121, %120 : vector<32x64xf32>
    %123 = arith.addf %118, %122 : vector<32x64xf32>
    %cst_54 = arith.constant 0.797884583 : f32
    %124 = vector.broadcast %cst_54 : f32 to vector<32x64xf32>
    %125 = arith.mulf %124, %123 : vector<32x64xf32>
    %126 = math.tanh %125 : vector<32x64xf32>
    %cst_55 = arith.constant 1.000000e+00 : f32
    %127 = vector.broadcast %cst_55 : f32 to vector<32x64xf32>
    %128 = arith.addf %127, %126 : vector<32x64xf32>
    %cst_56 = arith.constant 5.000000e-01 : f32
    %129 = vector.broadcast %cst_56 : f32 to vector<32x64xf32>
    %130 = arith.mulf %129, %128 : vector<32x64xf32>
    %131 = arith.mulf %118, %130 : vector<32x64xf32>
    %132 = arith.truncf %131 : vector<32x64xf32> to vector<32x64xbf16>
    %c0_57 = arith.constant 0 : index
    %c0_58 = arith.constant 0 : index
    %c0_59 = arith.constant 0 : index
    %133 = vector.load %arg13[%c0_57, %c0_58, %c0_59] : memref<2x64x32xbf16, #tpu.memory_space<vmem>>, vector<1x64x32xbf16>
    %134 = vector.shape_cast %133 : vector<1x64x32xbf16> to vector<64x32xbf16>
    %cst_60 = arith.constant dense<0.000000e+00> : vector<32x32xf32>
    %135 = tpu.matmul %132, %134, %cst_60 {dimension_numbers = #tpu.dot_dimension_numbers<[1], [0], [0], [1], [0, 0, 1, 1], [], []>} : vector<32x64xbf16>, vector<64x32xbf16>, vector<32x32xf32> -> vector<32x32xf32>
    %c0_61 = arith.constant 0 : index
    %c0_62 = arith.constant 0 : index
    %c0_63 = arith.constant 0 : index
    %136 = vector.load %arg14[%c0_61, %c0_62, %c0_63] : memref<2x1x32xf32, #tpu.memory_space<vmem>>, vector<1x1x32xf32>
    %137 = vector.shape_cast %136 : vector<1x1x32xf32> to vector<1x32xf32>
    %138 = vector.broadcast %137 : vector<1x32xf32> to vector<32x32xf32>
    %139 = arith.addf %135, %138 : vector<32x32xf32>
    %140 = arith.addf %110, %139 : vector<32x32xf32>
    %c0_64 = arith.constant 0 : index
    %c0_65 = arith.constant 0 : index
    %c0_66 = arith.constant 0 : index
    %141 = vector.load %arg15[%c0_64, %c0_65, %c0_66] : memref<2x1x32xf32, #tpu.memory_space<vmem>>, vector<1x1x32xf32>
    %142 = vector.shape_cast %141 : vector<1x1x32xf32> to vector<1x32xf32>
    %c0_67 = arith.constant 0 : index
    %c0_68 = arith.constant 0 : index
    %c0_69 = arith.constant 0 : index
    %143 = vector.load %arg16[%c0_67, %c0_68, %c0_69] : memref<2x1x32xf32, #tpu.memory_space<vmem>>, vector<1x1x32xf32>
    %144 = vector.shape_cast %143 : vector<1x1x32xf32> to vector<1x32xf32>
    %cst_70 = arith.constant dense<0.000000e+00> : vector<32xf32>
    %145 = vector.multi_reduction <add>, %140, %cst_70 [1] : vector<32x32xf32> to vector<32xf32>
    %146 = vector.shape_cast %145 : vector<32xf32> to vector<32x1xf32>
    %cst_71 = arith.constant 3.200000e+01 : f32
    %147 = vector.broadcast %cst_71 : f32 to vector<32x1xf32>
    %148 = arith.divf %146, %147 : vector<32x1xf32>
    %149 = vector.broadcast %148 : vector<32x1xf32> to vector<32x32xf32>
    %150 = arith.subf %140, %149 : vector<32x32xf32>
    %151 = arith.mulf %150, %150 : vector<32x32xf32>
    %cst_72 = arith.constant dense<0.000000e+00> : vector<32xf32>
    %152 = vector.multi_reduction <add>, %151, %cst_72 [1] : vector<32x32xf32> to vector<32xf32>
    %153 = vector.shape_cast %152 : vector<32xf32> to vector<32x1xf32>
    %cst_73 = arith.constant 3.200000e+01 : f32
    %154 = vector.broadcast %cst_73 : f32 to vector<32x1xf32>
    %155 = arith.divf %153, %154 : vector<32x1xf32>
    %156 = vector.broadcast %148 : vector<32x1xf32> to vector<32x32xf32>
    %157 = arith.subf %140, %156 : vector<32x32xf32>
    %cst_74 = arith.constant 9.99999996E-13 : f32
    %158 = vector.broadcast %cst_74 : f32 to vector<32x1xf32>
    %159 = arith.addf %155, %158 : vector<32x1xf32>
    %160 = math.rsqrt %159 : vector<32x1xf32>
    %161 = vector.broadcast %160 : vector<32x1xf32> to vector<32x32xf32>
    %162 = arith.mulf %157, %161 : vector<32x32xf32>
    %163 = vector.broadcast %142 : vector<1x32xf32> to vector<32x32xf32>
    %164 = arith.mulf %162, %163 : vector<32x32xf32>
    %165 = vector.broadcast %144 : vector<1x32xf32> to vector<32x32xf32>
    %166 = arith.addf %164, %165 : vector<32x32xf32>
    %167 = arith.truncf %166 : vector<32x32xf32> to vector<32x32xbf16>
    %c1 = arith.constant 1 : index
    %c0_75 = arith.constant 0 : index
    %c0_76 = arith.constant 0 : index
    %168 = vector.load %arg5[%c1, %c0_75, %c0_76] : memref<2x32x96xbf16, #tpu.memory_space<vmem>>, vector<1x32x96xbf16>
    %169 = vector.shape_cast %168 : vector<1x32x96xbf16> to vector<32x96xbf16>
    %cst_77 = arith.constant dense<0.000000e+00> : vector<32x96xf32>
    %170 = tpu.matmul %167, %169, %cst_77 {dimension_numbers = #tpu.dot_dimension_numbers<[1], [0], [0], [1], [0, 0, 1, 1], [], []>} : vector<32x32xbf16>, vector<32x96xbf16>, vector<32x96xf32> -> vector<32x96xf32>
    %c1_78 = arith.constant 1 : index
    %c0_79 = arith.constant 0 : index
    %c0_80 = arith.constant 0 : index
    %171 = vector.load %arg6[%c1_78, %c0_79, %c0_80] : memref<2x1x96xf32, #tpu.memory_space<vmem>>, vector<1x1x96xf32>
    %172 = vector.shape_cast %171 : vector<1x1x96xf32> to vector<1x96xf32>
    %173 = vector.broadcast %172 : vector<1x96xf32> to vector<32x96xf32>
    %174 = arith.addf %170, %173 : vector<32x96xf32>
    %175 = arith.truncf %174 : vector<32x96xf32> to vector<32x96xbf16>
    %c1_81 = arith.constant 1 : index
    %c0_82 = arith.constant 0 : index
    %c0_83 = arith.constant 0 : index
    %176 = vector.load %arg7[%c1_81, %c0_82, %c0_83] : memref<2x32x32xbf16, #tpu.memory_space<vmem>>, vector<1x32x32xbf16>
    %177 = vector.shape_cast %176 : vector<1x32x32xbf16> to vector<32x32xbf16>
    %cst_84 = arith.constant 0.000000e+00 : f32
    %178 = vector.broadcast %cst_84 : f32 to vector<32x32xf32>
    %179 = vector.extract_strided_slice %175 {offsets = [0, 0], sizes = [32, 16], strides = [1, 1]} : vector<32x96xbf16> to vector<32x16xbf16>
    %180 = vector.extract_strided_slice %175 {offsets = [0, 32], sizes = [32, 16], strides = [1, 1]} : vector<32x96xbf16> to vector<32x16xbf16>
    %181 = vector.extract_strided_slice %175 {offsets = [0, 64], sizes = [32, 16], strides = [1, 1]} : vector<32x96xbf16> to vector<32x16xbf16>
    %cst_85 = arith.constant dense<0.000000e+00> : vector<32x32xf32>
    %182 = tpu.matmul %179, %180, %cst_85 {dimension_numbers = #tpu.dot_dimension_numbers<[1], [1], [0], [0], [0, 0, 1, 0], [], []>} : vector<32x16xbf16>, vector<32x16xbf16>, vector<32x32xf32> -> vector<32x32xf32>
    %183 = arith.addf %182, %25 : vector<32x32xf32>
    %cst_86 = arith.constant dense<0xFF800000> : vector<32xf32>
    %184 = vector.multi_reduction <maximumf>, %183, %cst_86 [1] : vector<32x32xf32> to vector<32xf32>
    %185 = vector.shape_cast %184 : vector<32xf32> to vector<32x1xf32>
    %186 = vector.broadcast %185 : vector<32x1xf32> to vector<32x32xf32>
    %187 = arith.subf %183, %186 : vector<32x32xf32>
    %188 = math.exp %187 : vector<32x32xf32>
    %cst_87 = arith.constant dense<0.000000e+00> : vector<32xf32>
    %189 = vector.multi_reduction <add>, %188, %cst_87 [1] : vector<32x32xf32> to vector<32xf32>
    %190 = vector.shape_cast %189 : vector<32xf32> to vector<32x1xf32>
    %191 = tpu.reciprocal %190 {approx = true} : vector<32x1xf32> -> vector<32x1xf32>
    %192 = vector.broadcast %191 : vector<32x1xf32> to vector<32x32xf32>
    %193 = arith.mulf %188, %192 : vector<32x32xf32>
    %194 = arith.truncf %193 : vector<32x32xf32> to vector<32x32xbf16>
    %cst_88 = arith.constant dense<0.000000e+00> : vector<32x16xf32>
    %195 = tpu.matmul %194, %181, %cst_88 {dimension_numbers = #tpu.dot_dimension_numbers<[1], [0], [0], [1], [0, 0, 1, 1], [], []>} : vector<32x32xbf16>, vector<32x16xbf16>, vector<32x16xf32> -> vector<32x16xf32>
    %196 = arith.truncf %195 : vector<32x16xf32> to vector<32x16xbf16>
    %197 = vector.extract_strided_slice %177 {offsets = [0, 0], sizes = [16, 32], strides = [1, 1]} : vector<32x32xbf16> to vector<16x32xbf16>
    %cst_89 = arith.constant dense<0.000000e+00> : vector<32x32xf32>
    %198 = tpu.matmul %196, %197, %cst_89 {dimension_numbers = #tpu.dot_dimension_numbers<[1], [0], [0], [1], [0, 0, 1, 1], [], []>} : vector<32x16xbf16>, vector<16x32xbf16>, vector<32x32xf32> -> vector<32x32xf32>
    %199 = arith.addf %178, %198 : vector<32x32xf32>
    %200 = vector.extract_strided_slice %175 {offsets = [0, 16], sizes = [32, 16], strides = [1, 1]} : vector<32x96xbf16> to vector<32x16xbf16>
    %201 = vector.extract_strided_slice %175 {offsets = [0, 48], sizes = [32, 16], strides = [1, 1]} : vector<32x96xbf16> to vector<32x16xbf16>
    %202 = vector.extract_strided_slice %175 {offsets = [0, 80], sizes = [32, 16], strides = [1, 1]} : vector<32x96xbf16> to vector<32x16xbf16>
    %cst_90 = arith.constant dense<0.000000e+00> : vector<32x32xf32>
    %203 = tpu.matmul %200, %201, %cst_90 {dimension_numbers = #tpu.dot_dimension_numbers<[1], [1], [0], [0], [0, 0, 1, 0], [], []>} : vector<32x16xbf16>, vector<32x16xbf16>, vector<32x32xf32> -> vector<32x32xf32>
    %204 = arith.addf %203, %25 : vector<32x32xf32>
    %cst_91 = arith.constant dense<0xFF800000> : vector<32xf32>
    %205 = vector.multi_reduction <maximumf>, %204, %cst_91 [1] : vector<32x32xf32> to vector<32xf32>
    %206 = vector.shape_cast %205 : vector<32xf32> to vector<32x1xf32>
    %207 = vector.broadcast %206 : vector<32x1xf32> to vector<32x32xf32>
    %208 = arith.subf %204, %207 : vector<32x32xf32>
    %209 = math.exp %208 : vector<32x32xf32>
    %cst_92 = arith.constant dense<0.000000e+00> : vector<32xf32>
    %210 = vector.multi_reduction <add>, %209, %cst_92 [1] : vector<32x32xf32> to vector<32xf32>
    %211 = vector.shape_cast %210 : vector<32xf32> to vector<32x1xf32>
    %212 = tpu.reciprocal %211 {approx = true} : vector<32x1xf32> -> vector<32x1xf32>
    %213 = vector.broadcast %212 : vector<32x1xf32> to vector<32x32xf32>
    %214 = arith.mulf %209, %213 : vector<32x32xf32>
    %215 = arith.truncf %214 : vector<32x32xf32> to vector<32x32xbf16>
    %cst_93 = arith.constant dense<0.000000e+00> : vector<32x16xf32>
    %216 = tpu.matmul %215, %202, %cst_93 {dimension_numbers = #tpu.dot_dimension_numbers<[1], [0], [0], [1], [0, 0, 1, 1], [], []>} : vector<32x32xbf16>, vector<32x16xbf16>, vector<32x16xf32> -> vector<32x16xf32>
    %217 = arith.truncf %216 : vector<32x16xf32> to vector<32x16xbf16>
    %218 = vector.extract_strided_slice %177 {offsets = [16, 0], sizes = [16, 32], strides = [1, 1]} : vector<32x32xbf16> to vector<16x32xbf16>
    %cst_94 = arith.constant dense<0.000000e+00> : vector<32x32xf32>
    %219 = tpu.matmul %217, %218, %cst_94 {dimension_numbers = #tpu.dot_dimension_numbers<[1], [0], [0], [1], [0, 0, 1, 1], [], []>} : vector<32x16xbf16>, vector<16x32xbf16>, vector<32x32xf32> -> vector<32x32xf32>
    %220 = arith.addf %199, %219 : vector<32x32xf32>
    %c1_95 = arith.constant 1 : index
    %c0_96 = arith.constant 0 : index
    %c0_97 = arith.constant 0 : index
    %221 = vector.load %arg8[%c1_95, %c0_96, %c0_97] : memref<2x1x32xf32, #tpu.memory_space<vmem>>, vector<1x1x32xf32>
    %222 = vector.shape_cast %221 : vector<1x1x32xf32> to vector<1x32xf32>
    %223 = vector.broadcast %222 : vector<1x32xf32> to vector<32x32xf32>
    %224 = arith.addf %220, %223 : vector<32x32xf32>
    %225 = arith.addf %166, %224 : vector<32x32xf32>
    %c1_98 = arith.constant 1 : index
    %c0_99 = arith.constant 0 : index
    %c0_100 = arith.constant 0 : index
    %226 = vector.load %arg9[%c1_98, %c0_99, %c0_100] : memref<2x1x32xf32, #tpu.memory_space<vmem>>, vector<1x1x32xf32>
    %227 = vector.shape_cast %226 : vector<1x1x32xf32> to vector<1x32xf32>
    %c1_101 = arith.constant 1 : index
    %c0_102 = arith.constant 0 : index
    %c0_103 = arith.constant 0 : index
    %228 = vector.load %arg10[%c1_101, %c0_102, %c0_103] : memref<2x1x32xf32, #tpu.memory_space<vmem>>, vector<1x1x32xf32>
    %229 = vector.shape_cast %228 : vector<1x1x32xf32> to vector<1x32xf32>
    %cst_104 = arith.constant dense<0.000000e+00> : vector<32xf32>
    %230 = vector.multi_reduction <add>, %225, %cst_104 [1] : vector<32x32xf32> to vector<32xf32>
    %231 = vector.shape_cast %230 : vector<32xf32> to vector<32x1xf32>
    %cst_105 = arith.constant 3.200000e+01 : f32
    %232 = vector.broadcast %cst_105 : f32 to vector<32x1xf32>
    %233 = arith.divf %231, %232 : vector<32x1xf32>
    %234 = vector.broadcast %233 : vector<32x1xf32> to vector<32x32xf32>
    %235 = arith.subf %225, %234 : vector<32x32xf32>
    %236 = arith.mulf %235, %235 : vector<32x32xf32>
    %cst_106 = arith.constant dense<0.000000e+00> : vector<32xf32>
    %237 = vector.multi_reduction <add>, %236, %cst_106 [1] : vector<32x32xf32> to vector<32xf32>
    %238 = vector.shape_cast %237 : vector<32xf32> to vector<32x1xf32>
    %cst_107 = arith.constant 3.200000e+01 : f32
    %239 = vector.broadcast %cst_107 : f32 to vector<32x1xf32>
    %240 = arith.divf %238, %239 : vector<32x1xf32>
    %241 = vector.broadcast %233 : vector<32x1xf32> to vector<32x32xf32>
    %242 = arith.subf %225, %241 : vector<32x32xf32>
    %cst_108 = arith.constant 9.99999996E-13 : f32
    %243 = vector.broadcast %cst_108 : f32 to vector<32x1xf32>
    %244 = arith.addf %240, %243 : vector<32x1xf32>
    %245 = math.rsqrt %244 : vector<32x1xf32>
    %246 = vector.broadcast %245 : vector<32x1xf32> to vector<32x32xf32>
    %247 = arith.mulf %242, %246 : vector<32x32xf32>
    %248 = vector.broadcast %227 : vector<1x32xf32> to vector<32x32xf32>
    %249 = arith.mulf %247, %248 : vector<32x32xf32>
    %250 = vector.broadcast %229 : vector<1x32xf32> to vector<32x32xf32>
    %251 = arith.addf %249, %250 : vector<32x32xf32>
    %252 = arith.truncf %251 : vector<32x32xf32> to vector<32x32xbf16>
    %c1_109 = arith.constant 1 : index
    %c0_110 = arith.constant 0 : index
    %c0_111 = arith.constant 0 : index
    %253 = vector.load %arg11[%c1_109, %c0_110, %c0_111] : memref<2x32x64xbf16, #tpu.memory_space<vmem>>, vector<1x32x64xbf16>
    %254 = vector.shape_cast %253 : vector<1x32x64xbf16> to vector<32x64xbf16>
    %cst_112 = arith.constant dense<0.000000e+00> : vector<32x64xf32>
    %255 = tpu.matmul %252, %254, %cst_112 {dimension_numbers = #tpu.dot_dimension_numbers<[1], [0], [0], [1], [0, 0, 1, 1], [], []>} : vector<32x32xbf16>, vector<32x64xbf16>, vector<32x64xf32> -> vector<32x64xf32>
    %c1_113 = arith.constant 1 : index
    %c0_114 = arith.constant 0 : index
    %c0_115 = arith.constant 0 : index
    %256 = vector.load %arg12[%c1_113, %c0_114, %c0_115] : memref<2x1x64xf32, #tpu.memory_space<vmem>>, vector<1x1x64xf32>
    %257 = vector.shape_cast %256 : vector<1x1x64xf32> to vector<1x64xf32>
    %258 = vector.broadcast %257 : vector<1x64xf32> to vector<32x64xf32>
    %259 = arith.addf %255, %258 : vector<32x64xf32>
    %260 = arith.mulf %259, %259 : vector<32x64xf32>
    %261 = arith.mulf %259, %260 : vector<32x64xf32>
    %cst_116 = arith.constant 4.471500e-02 : f32
    %262 = vector.broadcast %cst_116 : f32 to vector<32x64xf32>
    %263 = arith.mulf %262, %261 : vector<32x64xf32>
    %264 = arith.addf %259, %263 : vector<32x64xf32>
    %cst_117 = arith.constant 0.797884583 : f32
    %265 = vector.broadcast %cst_117 : f32 to vector<32x64xf32>
    %266 = arith.mulf %265, %264 : vector<32x64xf32>
    %267 = math.tanh %266 : vector<32x64xf32>
    %cst_118 = arith.constant 1.000000e+00 : f32
    %268 = vector.broadcast %cst_118 : f32 to vector<32x64xf32>
    %269 = arith.addf %268, %267 : vector<32x64xf32>
    %cst_119 = arith.constant 5.000000e-01 : f32
    %270 = vector.broadcast %cst_119 : f32 to vector<32x64xf32>
    %271 = arith.mulf %270, %269 : vector<32x64xf32>
    %272 = arith.mulf %259, %271 : vector<32x64xf32>
    %273 = arith.truncf %272 : vector<32x64xf32> to vector<32x64xbf16>
    %c1_120 = arith.constant 1 : index
    %c0_121 = arith.constant 0 : index
    %c0_122 = arith.constant 0 : index
    %274 = vector.load %arg13[%c1_120, %c0_121, %c0_122] : memref<2x64x32xbf16, #tpu.memory_space<vmem>>, vector<1x64x32xbf16>
    %275 = vector.shape_cast %274 : vector<1x64x32xbf16> to vector<64x32xbf16>
    %cst_123 = arith.constant dense<0.000000e+00> : vector<32x32xf32>
    %276 = tpu.matmul %273, %275, %cst_123 {dimension_numbers = #tpu.dot_dimension_numbers<[1], [0], [0], [1], [0, 0, 1, 1], [], []>} : vector<32x64xbf16>, vector<64x32xbf16>, vector<32x32xf32> -> vector<32x32xf32>
    %c1_124 = arith.constant 1 : index
    %c0_125 = arith.constant 0 : index
    %c0_126 = arith.constant 0 : index
    %277 = vector.load %arg14[%c1_124, %c0_125, %c0_126] : memref<2x1x32xf32, #tpu.memory_space<vmem>>, vector<1x1x32xf32>
    %278 = vector.shape_cast %277 : vector<1x1x32xf32> to vector<1x32xf32>
    %279 = vector.broadcast %278 : vector<1x32xf32> to vector<32x32xf32>
    %280 = arith.addf %276, %279 : vector<32x32xf32>
    %281 = arith.addf %251, %280 : vector<32x32xf32>
    %c1_127 = arith.constant 1 : index
    %c0_128 = arith.constant 0 : index
    %c0_129 = arith.constant 0 : index
    %282 = vector.load %arg15[%c1_127, %c0_128, %c0_129] : memref<2x1x32xf32, #tpu.memory_space<vmem>>, vector<1x1x32xf32>
    %283 = vector.shape_cast %282 : vector<1x1x32xf32> to vector<1x32xf32>
    %c1_130 = arith.constant 1 : index
    %c0_131 = arith.constant 0 : index
    %c0_132 = arith.constant 0 : index
    %284 = vector.load %arg16[%c1_130, %c0_131, %c0_132] : memref<2x1x32xf32, #tpu.memory_space<vmem>>, vector<1x1x32xf32>
    %285 = vector.shape_cast %284 : vector<1x1x32xf32> to vector<1x32xf32>
    %cst_133 = arith.constant dense<0.000000e+00> : vector<32xf32>
    %286 = vector.multi_reduction <add>, %281, %cst_133 [1] : vector<32x32xf32> to vector<32xf32>
    %287 = vector.shape_cast %286 : vector<32xf32> to vector<32x1xf32>
    %cst_134 = arith.constant 3.200000e+01 : f32
    %288 = vector.broadcast %cst_134 : f32 to vector<32x1xf32>
    %289 = arith.divf %287, %288 : vector<32x1xf32>
    %290 = vector.broadcast %289 : vector<32x1xf32> to vector<32x32xf32>
    %291 = arith.subf %281, %290 : vector<32x32xf32>
    %292 = arith.mulf %291, %291 : vector<32x32xf32>
    %cst_135 = arith.constant dense<0.000000e+00> : vector<32xf32>
    %293 = vector.multi_reduction <add>, %292, %cst_135 [1] : vector<32x32xf32> to vector<32xf32>
    %294 = vector.shape_cast %293 : vector<32xf32> to vector<32x1xf32>
    %cst_136 = arith.constant 3.200000e+01 : f32
    %295 = vector.broadcast %cst_136 : f32 to vector<32x1xf32>
    %296 = arith.divf %294, %295 : vector<32x1xf32>
    %297 = vector.broadcast %289 : vector<32x1xf32> to vector<32x32xf32>
    %298 = arith.subf %281, %297 : vector<32x32xf32>
    %cst_137 = arith.constant 9.99999996E-13 : f32
    %299 = vector.broadcast %cst_137 : f32 to vector<32x1xf32>
    %300 = arith.addf %296, %299 : vector<32x1xf32>
    %301 = math.rsqrt %300 : vector<32x1xf32>
    %302 = vector.broadcast %301 : vector<32x1xf32> to vector<32x32xf32>
    %303 = arith.mulf %298, %302 : vector<32x32xf32>
    %304 = vector.broadcast %283 : vector<1x32xf32> to vector<32x32xf32>
    %305 = arith.mulf %303, %304 : vector<32x32xf32>
    %306 = vector.broadcast %285 : vector<1x32xf32> to vector<32x32xf32>
    %307 = arith.addf %305, %306 : vector<32x32xf32>
    %c0_138 = arith.constant 0 : index
    %c0_139 = arith.constant 0 : index
    %308 = vector.load %arg2[%c0_138, %c0_139] : memref<16x32xbf16, #tpu.memory_space<vmem>>, vector<16x32xbf16>
    %309 = arith.truncf %307 : vector<32x32xf32> to vector<32x32xbf16>
    %cst_140 = arith.constant dense<0.000000e+00> : vector<16x32xf32>
    %310 = tpu.matmul %308, %309, %cst_140 {dimension_numbers = #tpu.dot_dimension_numbers<[1], [0], [0], [1], [0, 0, 1, 1], [], []>} : vector<16x32xbf16>, vector<32x32xbf16>, vector<16x32xf32> -> vector<16x32xf32>
    %311 = arith.truncf %310 : vector<16x32xf32> to vector<16x32xbf16>
    %c0_141 = arith.constant 0 : index
    %c0_142 = arith.constant 0 : index
    %312 = vector.load %arg17[%c0_141, %c0_142] : memref<32x128xbf16, #tpu.memory_space<vmem>>, vector<32x128xbf16>
    %cst_143 = arith.constant dense<0.000000e+00> : vector<16x128xf32>
    %313 = tpu.matmul %311, %312, %cst_143 {dimension_numbers = #tpu.dot_dimension_numbers<[1], [0], [0], [1], [0, 0, 1, 1], [], []>} : vector<16x32xbf16>, vector<32x128xbf16>, vector<16x128xf32> -> vector<16x128xf32>
    %c0_144 = arith.constant 0 : index
    %c0_145 = arith.constant 0 : index
    %314 = vector.load %arg18[%c0_144, %c0_145] : memref<1x128xf32, #tpu.memory_space<vmem>>, vector<1x128xf32>
    %315 = vector.broadcast %314 : vector<1x128xf32> to vector<16x128xf32>
    %316 = arith.addf %313, %315 : vector<16x128xf32>
    %c0_146 = arith.constant 0 : index
    %c0_147 = arith.constant 0 : index
    %317 = vector.load %arg19[%c0_146, %c0_147] : memref<16x128xf32, #tpu.memory_space<vmem>>, vector<16x128xf32>
    tpu.vector_store %arg19[%c0_146, %c0_147], %316 {strides = array<i32>} : memref<16x128xf32, #tpu.memory_space<vmem>>, vector<16x128xf32>,
    return
  }
}

</mosaic_0001>

<bundles_post_ra>
// kernel: eq.22
= control target key start
LH: loop header
LB: loop body
LE: loop exit
PB: predicated region body
PF: predicated region fallthrough
CT: control target
= control target key end

     0   :  { %vm7_vm0 = vcmask 64512   ;;  %vm13_vm1 = vcmask 130112   ;;  %s39_s0 = inlined_call_operand.vmem [shape: s32[2,8], index: 0, kind: input, shape index: {}]   ;;  %s40_s1 = inlined_call_operand.vmem [shape: s32[16], index: 1, kind: output, shape index: {}]  }
   0x1   :  { %v4_v0 = vld [vmem:[%s39_s0] sm:$0x3]  ;;  %s22_s0 = smov 8  }
   0x2   :  { %5 = vst [vmem:[#allocation1] sm:$0x3] %v4_v0 }
   0x9   :  { %v10_v1 = vld [vmem:[#allocation1 + $0x1] sm:$0x1]   ;;  %v6_v2 = vld [vmem:[#allocation1] sm:$0x1]  }
   0xa   :  { %11 = vrot.lane.b32.xlu0 %v10_v1, %s22_s0  ;;  %8 = vst.msk [vmem:[#allocation0] sm:$0x1] %vm7_vm0, %v6_v2  }
  0x7c   :  { %v12_v3 = vpop.permute.xlu0 %11  }
  0x7d   :  { %14 = vst.msk [vmem:[#allocation0] sm:$0x1] %vm13_vm1, %v12_v3  }
  0x84   :  { %v18_v4 = vld [vmem:[#allocation0] sm:$0x1] }
  0x85   :  { %20 = vst [vmem:[%s40_s1] sm:$0x1] %v18_v4 }

// kernel: _lambda_.1
= control target key start
LH: loop header
LB: loop body
LE: loop exit
PB: predicated region body
PF: predicated region fallthrough
CT: control target
= control target key end

     0   :  { %vm69_vm0 = vcmask 261120   ;;  %vm239_vm1 = vcmask 130048   ;;  %s2686_s23 = smov 96   ;;  %s2688_s21 = smov 80   ;;  %vm956_vm2 = vcmask 523264   ;;  %vm2692_vm3 = vmmov 0   ;;  %s3261_s0 = inlined_call_operand.vmem [shape: f32[32,32], index: 0, kind: input, shape index: {}]   ;;  %s3262_s5 = inlined_call_operand.vmem [shape: bf16[2,32,96], index: 5, kind: input, shape index: {}]   ;;  %s3263_s3 = inlined_call_operand.vmem [shape: f32[1,32], index: 3, kind: input, shape index: {}]   ;;  %s3264_s4 = inlined_call_operand.vmem [shape: f32[1,32], index: 4, kind: input, shape index: {}]   ;;  %s3265_s6 = inlined_call_operand.vmem [shape: f32[2,1,96], index: 6, kind: input, shape index: {}]   ;;  %s3266_s1 = inlined_call_operand.vmem [shape: f32[32,32], index: 1, kind: input, shape index: {}]   ;;  %s3267_s7 = inlined_call_operand.vmem [shape: bf16[2,32,32], index: 7, kind: input, shape index: {}]   ;;  %s3268_s8 = inlined_call_operand.vmem [shape: f32[2,1,32], index: 8, kind: input, shape index: {}]   ;;  %s3269_s11 = inlined_call_operand.vmem [shape: bf16[2,32,64], index: 11, kind: input, shape index: {}]   ;;  %s3270_s9 = inlined_call_operand.vmem [shape: f32[2,1,32], index: 9, kind: input, shape index: {}]   ;;  %s3271_s10 = inlined_call_operand.vmem [shape: f32[2,1,32], index: 10, kind: input, shape index: {}]   ;;  %s3272_s13 = inlined_call_operand.vmem [shape: bf16[2,64,32], index: 13, kind: input, shape index: {}]   ;;  %s3273_s12 = inlined_call_operand.vmem [shape: f32[2,1,64], index: 12, kind: input, shape index: {}]   ;;  %s3274_s14 = inlined_call_operand.vmem [shape: f32[2,1,32], index: 14, kind: input, shape index: {}]   ;;  %s3275_s15 = inlined_call_operand.vmem [shape: f32[2,1,32], index: 15, kind: input, shape index: {}]   ;;  %s3276_s16 = inlined_call_operand.vmem [shape: f32[2,1,32], index: 16, kind: input, shape index: {}]   ;;  %s3277_s2 = inlined_call_operand.vmem [shape: bf16[16,32], index: 2, kind: input, shape index: {}]   ;;  %s3278_s17 = inlined_call_operand.vmem [shape: bf16[32,128], index: 17, kind: input, shape index: {}]   ;;  %s3279_s18 = inlined_call_operand.vmem [shape: f32[1,128], index: 18, kind: input, shape index: {}]   ;;  %s3280_s19 = inlined_call_operand.vmem [shape: f32[16,128], index: 19, kind: output, shape index: {}]  }
   0x1   :  { %3283 = sst [smem:[#allocation2_spill]] %s3261_s0  ;;  %v2172_v63 = vld [vmem:[%s3265_s6] ss:$0 sm:$0xff]  ;;  %s2690_s22 = smov 48  }
   0x2   :  { %3284 = sst [smem:[#allocation3_spill]] %s3262_s5  ;;  %s3287_s20 = sld [smem:[#allocation2_spill]] }
   0x3   :  { %3285 = sst [smem:[#allocation4_spill]] %s3263_s3  ;;  %s3288_s26 = sld [smem:[#allocation3_spill]] }
   0x4   :  { %3286 = sst [smem:[#allocation5_spill]] %s3264_s4  ;;  %s3289_s30 = sld [smem:[#allocation4_spill]] }
   0x5   :  { %s3290_s5 = sld [smem:[#allocation5_spill]] }
   0x8   :  { %v63_v0 = vld [vmem:[%s3287_s20] sm:$0xff]  ;;  %v65_v1 = vld [vmem:[%s3287_s20 + $0x10] sm:$0xff]  ;;  %v64_v2 = vld [vmem:[%s3287_s20 + $0x8] sm:$0xff] }
   0x9   :  { %v70_v3 = vsel %vm69_vm0, %v63_v0, 0.0  ;;  %v76_v4 = vsel %vm69_vm0, %v65_v1, 0.0  ;;  %v66_v5 = vld [vmem:[%s3287_s20 + $0x18] sm:$0xff]  ;;  %v73_v6 = vsel %vm69_vm0, %v64_v2, 0.0  ;;  %v2539_v28 = vld [vmem:[%s3288_s26] sm:$0xff]   ;;  %v2540_v29 = vld [vmem:[%s3288_s26 + $0x8] sm:$0xff]  }
   0xa   :  { %71 = vadd.xlane.f32.xlu0 %v70_v3  ;;  %77 = vadd.xlane.f32.xlu1 %v76_v4  ;;  %v79_v7 = vsel %vm69_vm0, %v66_v5, 0.0  ;;  %v2170_v44 = vld [vmem:[%s3289_s30] ss:$0 sm:$0xff]  ;;  %s2687_s20 = smov 64  }
   0xb   :  { %2356 = vmatprep.subr.bf16.mxu0 %v2539_v28  ;;  %v2171_v50 = vld [vmem:[%s3290_s5] ss:$0 sm:$0xff]  ;;  %s2689_s5 = smov 112  }
   0xc   :  { %2357 = vmatpush3.bf16.msra.mxu0 %v2539_v28 }
   0xd   :  { %2358 = vmatprep.subr.bf16.mxu0 %v2540_v29 }
   0xe   :  { %74 = vadd.xlane.f32.xlu0 %v73_v6  ;;  %80 = vadd.xlane.f32.xlu1 %v79_v7 }
  0x10   :  { %2359 = vmatpush3.bf16.msra.mxu0 %v2540_v29 }
  0x97   :  { %v72_v8 = vpop.xlane.xlu0 %71  ;;  %v78_v9 = vpop.xlane.xlu1 %77 }
  0x98   :  { %v83_v10 = vmul.f32 0.03125, %v72_v8  ;;  %v85_v11 = vmul.f32 0.03125, %v78_v9 }
  0x9a   :  { %v87_v12 = vsub.f32 %v63_v0, %v83_v10  ;;  %v89_v13 = vsub.f32 %v65_v1, %v85_v11 }
  0x9b   :  { %v75_v14 = vpop.xlane.xlu0 %74  ;;  %v81_v15 = vpop.xlane.xlu1 %80 }
  0x9c   :  { %v84_v16 = vmul.f32 0.03125, %v75_v14  ;;  %v86_v17 = vmul.f32 0.03125, %v81_v15  ;;  %v91_v18 = vmul.f32 %v87_v12, %v87_v12  ;;  %v93_v19 = vmul.f32 %v89_v13, %v89_v13 }
  0x9e   :  { %v88_v20 = vsub.f32 %v64_v2, %v84_v16  ;;  %v90_v21 = vsub.f32 %v66_v5, %v86_v17  ;;  %v95_v22 = vsel %vm69_vm0, %v91_v18, 0.0  ;;  %v101_v23 = vsel %vm69_vm0, %v93_v19, 0.0  ;;  %v2866_v16 = vld [vmem:[%s3266_s1 + $0x18] sm:$0xff]  ;;  %v2871_v17 = vld [vmem:[%s3266_s1 + $0x8] sm:$0xff] }
  0x9f   :  { %96 = vadd.xlane.f32.xlu0 %v95_v22 }
  0xa0   :  { %v92_v24 = vmul.f32 %v88_v20, %v88_v20  ;;  %v94_v25 = vmul.f32 %v90_v21, %v90_v21 }
  0xa2   :  { %v98_v26 = vsel %vm69_vm0, %v92_v24, 0.0  ;;  %v104_v27 = vsel %vm69_vm0, %v94_v25, 0.0 }
  0xa3   :  { %102 = vadd.xlane.f32.xlu0 %v101_v23  ;;  %99 = vadd.xlane.f32.xlu1 %v98_v26 }
  0xa7   :  { %105 = vadd.xlane.f32.xlu1 %v104_v27 }
 0x12c   :  { %v97_v30 = vpop.xlane.xlu0 %96 }
 0x12d   :  { %v107_v31 = vmul.f32 0.03125, %v97_v30 }
 0x12f   :  { %v111_v32 = vadd.f32 1e-12, %v107_v31 }
 0x130   :  { %v100_v33 = vpop.xlane.xlu1 %99  ;;  %v103_v34 = vpop.xlane.xlu0 %102 }
 0x131   :  { %2562 = vrsqrt.f32 %v111_v32  ;;  %v108_v35 = vmul.f32 0.03125, %v100_v33  ;;  %v109_v36 = vmul.f32 0.03125, %v103_v34 }
 0x133   :  { %v112_v37 = vadd.f32 1e-12, %v108_v35  ;;  %v113_v38 = vadd.f32 1e-12, %v109_v36 }
 0x134   :  { %v106_v39 = vpop.xlane.xlu1 %105 }
 0x135   :  { %2564 = vrsqrt.f32 %v112_v37  ;;  %v110_v40 = vmul.f32 0.03125, %v106_v39 }
 0x136   :  { %2566 = vrsqrt.f32 %v113_v38 }
 0x137   :  { %v114_v41 = vadd.f32 1e-12, %v110_v40 }
 0x139   :  { %2568 = vrsqrt.f32 %v114_v41 }
 0x13b   :  { %v2563_v42 = vpop.eup %2562 }
 0x13c   :  { %v119_v43 = vmul.f32 %v2563_v42, %v87_v12 }
 0x13e   :  { %v129_v48 = vmul.f32 %v2170_v44, %v119_v43 }
 0x13f   :  { %v2565_v45 = vpop.eup %2564 }
 0x140   :  { %v2567_v46 = vpop.eup %2566  ;;  %v120_v47 = vmul.f32 %v2565_v45, %v88_v20  ;;  %v2825_v54 = vadd.f32 %v2171_v50, %v129_v48  ;;  %v2877_v20 = vld [vmem:[%s3266_s1 + $0x10] sm:$0xff] }
 0x141   :  { %v121_v49 = vmul.f32 %v2567_v46, %v89_v13  ;;  %v2861_v13 = vld [vmem:[%s3266_s1] sm:$0xff] }
 0x142   :  { %v130_v51 = vmul.f32 %v2170_v44, %v120_v47 }
 0x143   :  { %v2569_v52 = vpop.eup %2568  ;;  %v131_v56 = vmul.f32 %v2170_v44, %v121_v49 }
 0x144   :  { %v122_v53 = vmul.f32 %v2569_v52, %v90_v21  ;;  %v2827_v55 = vadd.f32 %v2171_v50, %v130_v51 }
 0x145   :  { %v2832_v59 = vadd.f32 %v2171_v50, %v131_v56 }
 0x146   :  { %v147_v57 = vpack.c.bf16 %v2827_v55, %v2825_v54  ;;  %v132_v58 = vmul.f32 %v2170_v44, %v122_v53 }
 0x148   :  { %2360 = vmatprep.mubr.msk.bf16.mxu0 %vm69_vm0, %v147_v57  ;;  %v2834_v60 = vadd.f32 %v2171_v50, %v132_v58 }
 0x14a   :  { %v148_v61 = vpack.c.bf16 %v2834_v60, %v2832_v59 }
 0x14c   :  { %2361 = vmatmul.mubr.msk.bf16.vlgmr.msra.gmra.mrb[0].mxu0 %vm69_vm0, %v148_v61 }
 0x21f   :  { %v2362_v62 = vpop.f32.mrb[0].mxu0 }
 0x220   :  { %v212_v0 = vpop.f32.mrb[1].mxu0  ;;  %v221_v2 = vadd.f32 %v2362_v62, %v2172_v63 }
 0x221   :  { %v2363_v1 = vpop.f32.mrb[2].mxu0  ;;  %v213_v5 = vadd.f32 %v2172_v63, %v212_v0 }
 0x222   :  { %v224_v3 = vadd.f32 %v2363_v1, %v2172_v63  ;;  %v215_v4 = vpop.f32.mrb[3].mxu0 }
 0x223   :  { %v216_v6 = vadd.f32 %v2172_v63, %v215_v4 }
 0x224   :  { %v2842_v7 = vpack.c.bf16 %v224_v3, %v221_v2 }
 0x225   :  { %v2844_v8 = vpack.c.bf16 %v216_v6, %v213_v5 }
 0x226   :  { %237 = vrot.lane.b32.xlu1 %v2842_v7, %s2686_s23 }
 0x227   :  { %235 = vrot.lane.b32.xlu0 %v2844_v8, %s2686_s23  ;;  %2368 = vmatprep.mubr.msk.bf16.mxu1 %vm239_vm1, %v2844_v8 }
 0x298   :  { %v238_v11 = vpop.permute.xlu1 %237 }
 0x299   :  { %v236_v9 = vpop.permute.xlu0 %235  ;;  %v250_v12 = vsel %vm239_vm1, %v238_v11, 0 }
 0x29a   :  { %2524 = vmatprep.subr.msk.bf16.mxu1 %vm239_vm1, %v236_v9  ;;  %v247_v10 = vsel %vm239_vm1, %v236_v9, 0 }
 0x29b   :  { %2365 = vmatpush3.bf16.xpose.msra.mxu1 %v247_v10 }
 0x29c   :  { %2525 = vmatprep.subr.msk.bf16.mxu1 %vm239_vm1, %v238_v11 }
 0x2a3   :  { %2367 = vmatpush3.bf16.xpose.msra.mxu1 %v250_v12 }
 0x2aa   :  { %2369 = vmatmul.mubr.msk.bf16.vlgmr.msra.gmra.mrb[0].mxu1 %vm239_vm1, %v2842_v7 }
 0x37d   :  { %v2370_v14 = vpop.f32.mrb[0].mxu1 }
 0x37e   :  { %v286_v15 = vpop.f32.mrb[1].mxu1  ;;  %v295_v25 = vadd.f32 %v2370_v14, %v2877_v20 }
 0x37f   :  { %v287_v18 = vadd.f32 %v286_v15, %v2861_v13  ;;  %v2371_v19 = vpop.f32.mrb[2].mxu1 }
 0x380   :  { %v289_v21 = vpop.f32.mrb[3].mxu1  ;;  %v298_v22 = vadd.f32 %v2371_v19, %v2866_v16  ;;  %v307_v28 = vsel %vm69_vm0, %v295_v25, -inf }
 0x381   :  { %v290_v23 = vadd.f32 %v289_v21, %v2871_v17  ;;  %v301_v24 = vsel %vm69_vm0, %v287_v18, -inf }
 0x382   :  { %302 = vmax.xlane.f32.xlu1 %v301_v24  ;;  %v310_v27 = vsel %vm69_vm0, %v298_v22, -inf }
 0x383   :  { %v304_v26 = vsel %vm69_vm0, %v290_v23, -inf }
 0x384   :  { %305 = vmax.xlane.f32.xlu0 %v304_v26 }
 0x386   :  { %311 = vmax.xlane.f32.xlu1 %v310_v27 }
 0x388   :  { %308 = vmax.xlane.f32.xlu0 %v307_v28 }
 0x397   :  { %349 = vrot.lane.b32.xlu1 %v2842_v7, %s2687_s20 }
 0x40f   :  { %v303_v29 = vpop.xlane.xlu1 %302 }
 0x410   :  { %v313_v33 = vsub.f32 %v287_v18, %v303_v29 }
 0x411   :  { %v306_v30 = vpop.xlane.xlu0 %305 }
 0x412   :  { %v314_v31 = vsub.f32 %v290_v23, %v306_v30  ;;  %v317_v39 = vmul.f32 1.442695, %v313_v33 }
 0x413   :  { %v312_v32 = vpop.xlane.xlu1 %311 }
 0x414   :  { %v316_v34 = vsub.f32 %v298_v22, %v312_v32  ;;  %v319_v35 = vmul.f32 1.442695, %v314_v31 }
 0x415   :  { %v309_v36 = vpop.xlane.xlu0 %308 }
 0x416   :  { %v323_v37 = vmul.f32 1.442695, %v316_v34  ;;  %v315_v38 = vsub.f32 %v295_v25, %v309_v36 }
 0x417   :  { %v350_v49 = vpop.permute.xlu1 %349 }
 0x418   :  { %2570 = vpow2.f32 %v323_v37  ;;  %v321_v40 = vmul.f32 1.442695, %v315_v38 }
 0x419   :  { %2572 = vpow2.f32 %v319_v35 }
 0x41a   :  { %2574 = vpow2.f32 %v321_v40 }
 0x41b   :  { %2576 = vpow2.f32 %v317_v39 }
 0x422   :  { %v2571_v41 = vpop.eup %2570 }
 0x423   :  { %v2573_v42 = vpop.eup %2572  ;;  %v334_v43 = vsel %vm69_vm0, %v2571_v41, 0.0 }
 0x424   :  { %v2575_v44 = vpop.eup %2574  ;;  %335 = vadd.xlane.f32.xlu1 %v334_v43  ;;  %v328_v47 = vsel %vm69_vm0, %v2573_v42, 0.0 }
 0x425   :  { %v331_v45 = vsel %vm69_vm0, %v2575_v44, 0.0  ;;  %v2577_v46 = vpop.eup %2576 }
 0x426   :  { %332 = vadd.xlane.f32.xlu0 %v331_v45  ;;  %v325_v48 = vsel %vm69_vm0, %v2577_v46, 0.0 }
 0x428   :  { %329 = vadd.xlane.f32.xlu1 %v328_v47 }
 0x42a   :  { %326 = vadd.xlane.f32.xlu0 %v325_v48 }
 0x439   :  { %414 = vrot.lane.b32.xlu1 %v2844_v8, %s2688_s21 }
 0x43d   :  { %416 = vrot.lane.b32.xlu1 %v2842_v7, %s2688_s21 }
 0x440   :  { %347 = vrot.lane.b32.xlu0 %v2844_v8, %s2687_s20 }
 0x441   :  { %412 = vrot.lane.b32.xlu1 %v2842_v7, %s2689_s5 }
 0x444   :  { %410 = vrot.lane.b32.xlu0 %v2844_v8, %s2689_s5 }
 0x4b1   :  { %v336_v50 = vpop.xlane.xlu1 %335 }
 0x4b3   :  { %v333_v51 = vpop.xlane.xlu0 %332 }
 0x4b4   :  { %2578 = vrcp.f32 %v333_v51 }
 0x4b5   :  { %v330_v52 = vpop.xlane.xlu1 %329 }
 0x4b6   :  { %2580 = vrcp.f32 %v330_v52 }
 0x4b7   :  { %2582 = vrcp.f32 %v336_v50  ;;  %v327_v53 = vpop.xlane.xlu0 %326 }
 0x4b8   :  { %2584 = vrcp.f32 %v327_v53 }
 0x4b9   :  { %v415_v62 = vpop.permute.xlu1 %414 }
 0x4ba   :  { %v425_v9 = vsel %vm239_vm1, %v415_v62, 0 }
 0x4bb   :  { %v348_v56 = vpop.permute.xlu0 %347 }
 0x4bc   :  { %2372 = vmatprep.subr.bf16.mxu0 %v348_v56 }
 0x4bd   :  { %2373 = vmatpush3.bf16.msra.mxu0 %v348_v56  ;;  %v417_v10 = vpop.permute.xlu1 %416 }
 0x4be   :  { %2374 = vmatprep.subr.bf16.mxu0 %v350_v49  ;;  %v2579_v57 = vpop.eup %2578  ;;  %v428_v11 = vsel %vm239_vm1, %v417_v10, 0 }
 0x4bf   :  { %v343_v0 = vmul.f32 %v2579_v57, %v2575_v44  ;;  %v411_v6 = vpop.permute.xlu0 %410 }
 0x4c0   :  { %v2581_v58 = vpop.eup %2580 }
 0x4c1   :  { %v2583_v61 = vpop.eup %2582  ;;  %2375 = vmatpush3.bf16.msra.mxu0 %v350_v49  ;;  %v342_v2 = vmul.f32 %v2581_v58, %v2573_v42  ;;  %v413_v12 = vpop.permute.xlu1 %412 }
 0x4c2   :  { %v2585_v63 = vpop.eup %2584  ;;  %2526 = vmatprep.subr.msk.bf16.mxu0 %vm239_vm1, %v415_v62  ;;  %v344_v3 = vmul.f32 %v2583_v61, %v2571_v41 }
 0x4c3   :  { %v341_v1 = vmul.f32 %v2585_v63, %v2577_v46 }
 0x4c4   :  { %v346_v5 = vpack.c.bf16 %v344_v3, %v343_v0  ;;  %v2541_v0 = vld [vmem:[%s3267_s7 + $0x8] sm:$0xff]  }
 0x4c5   :  { %v345_v4 = vpack.c.bf16 %v342_v2, %v341_v1 }
 0x4c7   :  { %2376 = vmatprep.mubr.msk.bf16.mxu0 %vm69_vm0, %v345_v4 }
 0x4c8   :  { %2377 = vmatmul.mubr.msk.bf16.vlgmr.msra.gmra.mrb[4].mxu0 %vm69_vm0, %v346_v5 }
 0x4c9   :  { %2384 = vmatprep.mubr.msk.bf16.mxu0 %vm239_vm1, %v411_v6 }
 0x4ca   :  { %2381 = vmatpush3.bf16.xpose.msra.mxu0 %v425_v9 }
 0x4cb   :  { %2527 = vmatprep.subr.msk.bf16.mxu0 %vm239_vm1, %v417_v10 }
 0x4d2   :  { %2383 = vmatpush3.bf16.xpose.msra.mxu0 %v428_v11 }
 0x4d9   :  { %2385 = vmatmul.mubr.msk.bf16.vlgmr.msra.gmra.mrb[8].mxu0 %vm239_vm1, %v413_v12  ;;  %v2542_v12 = vld [vmem:[%s3267_s7] sm:$0xff]  }
 0x59b   :  { %v2910_v14 = vpop.f32.mrb[4].mxu0 }
 0x59c   :  { %v2912_v15 = vpop.f32.mrb[5].mxu0 }
 0x59d   :  { %v2914_v18 = vpop.f32.mrb[6].mxu0 }
 0x59e   :  { %v409_v19 = vpack.c.bf16 %v2914_v18, %v2910_v14  ;;  %v2918_v21 = vpop.f32.mrb[7].mxu0 }
 0x59f   :  { %v408_v22 = vpack.c.bf16 %v2918_v21, %v2912_v15 }
 0x5ac   :  { %v2386_v23 = vpop.f32.mrb[8].mxu0 }
 0x5ad   :  { %v464_v24 = vpop.f32.mrb[9].mxu0  ;;  %v473_v28 = vadd.f32 %v2386_v23, %v2877_v20 }
 0x5ae   :  { %v465_v25 = vadd.f32 %v464_v24, %v2861_v13  ;;  %v2387_v26 = vpop.f32.mrb[10].mxu0 }
 0x5af   :  { %v467_v27 = vpop.f32.mrb[11].mxu0  ;;  %v476_v32 = vadd.f32 %v2387_v26, %v2866_v16  ;;  %v485_v33 = vsel %vm69_vm0, %v473_v28, -inf }
 0x5b0   :  { %v468_v29 = vadd.f32 %v467_v27, %v2871_v17  ;;  %v479_v30 = vsel %vm69_vm0, %v465_v25, -inf }
 0x5b1   :  { %480 = vmax.xlane.f32.xlu0 %v479_v30  ;;  %v488_v34 = vsel %vm69_vm0, %v476_v32, -inf }
 0x5b2   :  { %v482_v31 = vsel %vm69_vm0, %v468_v29, -inf }
 0x5b3   :  { %483 = vmax.xlane.f32.xlu1 %v482_v31 }
 0x5b5   :  { %486 = vmax.xlane.f32.xlu0 %v485_v33 }
 0x5b9   :  { %489 = vmax.xlane.f32.xlu0 %v488_v34 }
 0x63e   :  { %v481_v35 = vpop.xlane.xlu0 %480 }
 0x63f   :  { %v491_v36 = vsub.f32 %v465_v25, %v481_v35 }
 0x640   :  { %v484_v37 = vpop.xlane.xlu1 %483 }
 0x641   :  { %v495_v40 = vmul.f32 1.442695, %v491_v36  ;;  %v492_v41 = vsub.f32 %v468_v29, %v484_v37  ;;  %v2191_v29 = vld [vmem:[%s3268_s8] ss:$0 sm:$0xff] }
 0x642   :  { %v487_v38 = vpop.xlane.xlu0 %486 }
 0x643   :  { %v493_v39 = vsub.f32 %v473_v28, %v487_v38  ;;  %v497_v45 = vmul.f32 1.442695, %v492_v41 }
 0x645   :  { %v499_v42 = vmul.f32 1.442695, %v493_v39 }
 0x646   :  { %v490_v43 = vpop.xlane.xlu0 %489 }
 0x647   :  { %2586 = vpow2.f32 %v499_v42  ;;  %v494_v44 = vsub.f32 %v476_v32, %v490_v43 }
 0x648   :  { %2588 = vpow2.f32 %v495_v40 }
 0x649   :  { %v501_v46 = vmul.f32 1.442695, %v494_v44 }
 0x64b   :  { %2590 = vpow2.f32 %v501_v46 }
 0x64c   :  { %2592 = vpow2.f32 %v497_v45 }
 0x651   :  { %v2587_v47 = vpop.eup %2586 }
 0x652   :  { %v509_v48 = vsel %vm69_vm0, %v2587_v47, 0.0  ;;  %v2589_v49 = vpop.eup %2588 }
 0x653   :  { %510 = vadd.xlane.f32.xlu0 %v509_v48  ;;  %v503_v51 = vsel %vm69_vm0, %v2589_v49, 0.0 }
 0x655   :  { %v2591_v50 = vpop.eup %2590 }
 0x656   :  { %v512_v52 = vsel %vm69_vm0, %v2591_v50, 0.0  ;;  %v2593_v53 = vpop.eup %2592 }
 0x657   :  { %504 = vadd.xlane.f32.xlu0 %v503_v51  ;;  %513 = vadd.xlane.f32.xlu1 %v512_v52  ;;  %v506_v56 = vsel %vm69_vm0, %v2593_v53, 0.0 }
 0x65b   :  { %507 = vadd.xlane.f32.xlu1 %v506_v56 }
 0x66c   :  { %527 = vrot.lane.b32.xlu1 %v2842_v7, %s2690_s22 }
 0x66d   :  { %525 = vrot.lane.b32.xlu0 %v2844_v8, %s2690_s22 }
 0x6e0   :  { %v511_v57 = vpop.xlane.xlu0 %510 }
 0x6e4   :  { %v514_v58 = vpop.xlane.xlu1 %513  ;;  %v505_v61 = vpop.xlane.xlu0 %504 }
 0x6e5   :  { %2594 = vrcp.f32 %v514_v58  ;;  %v2543_v58 = vld [vmem:[%s3269_s11] sm:$0xff]  }
 0x6e6   :  { %2596 = vrcp.f32 %v505_v61  ;;  %2408 = vmatprep.subr.bf16.mxu0 %v2543_v58  ;;  %v2544_v61 = vld [vmem:[%s3269_s11 + $0x8] sm:$0xff]  }
 0x6e7   :  { %2598 = vrcp.f32 %v511_v57  ;;  %2409 = vmatpush3.bf16.msra.mxu0 %v2543_v58 }
 0x6e8   :  { %v508_v62 = vpop.xlane.xlu1 %507  ;;  %v526_v63 = vpop.permute.xlu0 %525  ;;  %2410 = vmatprep.subr.bf16.mxu0 %v2544_v61 }
 0x6e9   :  { %2600 = vrcp.f32 %v508_v62  ;;  %2388 = vmatprep.subr.bf16.mxu1 %v526_v63 }
 0x6ea   :  { %2389 = vmatpush3.bf16.msra.mxu1 %v526_v63 }
 0x6eb   :  { %2411 = vmatpush3.bf16.msra.mxu0 %v2544_v61 }
 0x6ec   :  { %v528_v1 = vpop.permute.xlu1 %527 }
 0x6ed   :  { %2390 = vmatprep.subr.bf16.mxu1 %v528_v1 }
 0x6ee   :  { %2391 = vmatpush3.bf16.msra.mxu1 %v528_v1 }
 0x6ef   :  { %2396 = vmatprep.subr.bf16.mxu1 %v2541_v0  ;;  %v2595_v7 = vpop.eup %2594 }
 0x6f0   :  { %v2597_v8 = vpop.eup %2596  ;;  %v522_v4 = vmul.f32 %v2595_v7, %v2591_v50 }
 0x6f1   :  { %v2599_v2 = vpop.eup %2598  ;;  %v519_v5 = vmul.f32 %v2597_v8, %v2589_v49 }
 0x6f2   :  { %v521_v9 = vmul.f32 %v2599_v2, %v2587_v47 }
 0x6f3   :  { %v2601_v3 = vpop.eup %2600 }
 0x6f4   :  { %v520_v6 = vmul.f32 %v2601_v3, %v2593_v53  ;;  %v524_v11 = vpack.c.bf16 %v522_v4, %v521_v9 }
 0x6f6   :  { %v523_v10 = vpack.c.bf16 %v520_v6, %v519_v5 }
 0x6f8   :  { %2392 = vmatprep.mubr.msk.bf16.mxu1 %vm69_vm0, %v523_v10 }
 0x6f9   :  { %2393 = vmatmul.mubr.msk.bf16.vlgmr.msra.gmra.mrb[4].mxu1 %vm69_vm0, %v524_v11  ;;  %v2192_v11 = vld [vmem:[%s3270_s9] ss:$0 sm:$0xff] }
 0x6fa   :  { %2397 = vmatpush3.bf16.msra.mxu1 %v2541_v0 }
 0x6fb   :  { %2402 = vmatprep.subr.bf16.mxu1 %v2542_v12 }
 0x7cc   :  { %v2394_v23 = vpop.f32.mrb[4].mxu1 }
 0x7cd   :  { %v571_v24 = vpop.f32.mrb[5].mxu1 }
 0x7ce   :  { %v2395_v25 = vpop.f32.mrb[6].mxu1 }
 0x7cf   :  { %v587_v26 = vpack.c.bf16 %v2395_v25, %v2394_v23  ;;  %v574_v27 = vpop.f32.mrb[7].mxu1 }
 0x7d0   :  { %v586_v28 = vpack.c.bf16 %v574_v27, %v571_v24 }
 0x7d2   :  { %2398 = vmatprep.mubr.msk.bf16.mxu1 %vm239_vm1, %v586_v28 }
 0x7d3   :  { %2399 = vmatmul.mubr.msk.bf16.vlgmr.msra.gmra.mrb[8].mxu1 %vm239_vm1, %v587_v26  ;;  %v2193_v26 = vld [vmem:[%s3271_s10] ss:$0 sm:$0xff] }
 0x7d4   :  { %2403 = vmatpush3.bf16.msra.mxu1 %v2542_v12  ;;  %2404 = vmatprep.mubr.msk.bf16.mxu1 %vm239_vm1, %v408_v22 }
 0x7df   :  { %2405 = vmatmul.mubr.msk.bf16.vlgmr.msra.gmra.mrb[8].mxu1 %vm239_vm1, %v409_v19 }
 0x8b2   :  { %v2406_v30 = vpop.f32.mrb[8].mxu1 }
 0x8b3   :  { %v695_v31 = vpop.f32.mrb[9].mxu1  ;;  %v719_v36 = vadd.f32 %v2406_v30, %v2191_v29 }
 0x8b4   :  { %v717_v32 = vadd.f32 %v2191_v29, %v695_v31  ;;  %v2407_v33 = vpop.f32.mrb[10].mxu1 }
 0x8b5   :  { %v720_v34 = vadd.f32 %v2407_v33, %v2191_v29  ;;  %v698_v35 = vpop.f32.mrb[11].mxu1  ;;  %v723_v22 = vadd.f32 %v719_v36, %v2832_v59 }
 0x8b6   :  { %v718_v37 = vadd.f32 %v2191_v29, %v698_v35  ;;  %v721_v15 = vadd.f32 %v717_v32, %v2825_v54 }
 0x8b7   :  { %v724_v18 = vadd.f32 %v720_v34, %v2834_v60  ;;  %v733_v39 = vsel %vm69_vm0, %v723_v22, 0.0 }
 0x8b8   :  { %v727_v21 = vsel %vm69_vm0, %v721_v15, 0.0  ;;  %v722_v14 = vadd.f32 %v718_v37, %v2827_v55 }
 0x8b9   :  { %728 = vadd.xlane.f32.xlu1 %v727_v21  ;;  %v736_v38 = vsel %vm69_vm0, %v724_v18, 0.0 }
 0x8ba   :  { %v730_v19 = vsel %vm69_vm0, %v722_v14, 0.0 }
 0x8bb   :  { %731 = vadd.xlane.f32.xlu0 %v730_v19  ;;  %v2547_v19 = vld [vmem:[%s3272_s13 + $0x10] sm:$0xff]  }
 0x8bd   :  { %737 = vadd.xlane.f32.xlu1 %v736_v38  ;;  %v2194_v38 = vld [vmem:[%s3273_s12] ss:$0 sm:$0xff] }
 0x8bf   :  { %734 = vadd.xlane.f32.xlu0 %v733_v39 }
 0x946   :  { %v729_v40 = vpop.xlane.xlu1 %728 }
 0x947   :  { %v739_v54 = vmul.f32 0.03125, %v729_v40 }
 0x948   :  { %v732_v41 = vpop.xlane.xlu0 %731 }
 0x949   :  { %v743_v42 = vsub.f32 %v721_v15, %v739_v54  ;;  %v740_v43 = vmul.f32 0.03125, %v732_v41 }
 0x94a   :  { %v738_v55 = vpop.xlane.xlu1 %737 }
 0x94b   :  { %v744_v44 = vsub.f32 %v722_v14, %v740_v43  ;;  %v742_v60 = vmul.f32 0.03125, %v738_v55  ;;  %v747_v45 = vmul.f32 %v743_v42, %v743_v42  ;;  %v2545_v14 = vld [vmem:[%s3272_s13] sm:$0xff]  }
 0x94c   :  { %v735_v46 = vpop.xlane.xlu0 %734  ;;  %2416 = vmatprep.subr.bf16.mxu0 %v2545_v14 }
 0x94d   :  { %v746_v47 = vsub.f32 %v724_v18, %v742_v60  ;;  %v741_v48 = vmul.f32 0.03125, %v735_v46  ;;  %v751_v59 = vsel %vm69_vm0, %v747_v45, 0.0  ;;  %v748_v49 = vmul.f32 %v744_v44, %v744_v44  ;;  %v2546_v18 = vld [vmem:[%s3272_s13 + $0x8] sm:$0xff]  }
 0x94e   :  { %752 = vadd.xlane.f32.xlu0 %v751_v59 }
 0x94f   :  { %v745_v50 = vsub.f32 %v723_v22, %v741_v48  ;;  %v754_v51 = vsel %vm69_vm0, %v748_v49, 0.0  ;;  %v750_v52 = vmul.f32 %v746_v47, %v746_v47  ;;  %v2548_v22 = vld [vmem:[%s3272_s13 + $0x18] sm:$0xff]  }
 0x950   :  { %755 = vadd.xlane.f32.xlu1 %v754_v51 }
 0x951   :  { %v749_v53 = vmul.f32 %v745_v50, %v745_v50  ;;  %v760_v56 = vsel %vm69_vm0, %v750_v52, 0.0 }
 0x953   :  { %v757_v57 = vsel %vm69_vm0, %v749_v53, 0.0 }
 0x954   :  { %761 = vadd.xlane.f32.xlu1 %v760_v56  ;;  %758 = vadd.xlane.f32.xlu0 %v757_v57 }
 0x9db   :  { %v753_v62 = vpop.xlane.xlu0 %752 }
 0x9dc   :  { %v763_v63 = vmul.f32 0.03125, %v753_v62 }
 0x9dd   :  { %v756_v0 = vpop.xlane.xlu1 %755 }
 0x9de   :  { %v767_v1 = vadd.f32 1e-12, %v763_v63  ;;  %v764_v7 = vmul.f32 0.03125, %v756_v0 }
 0x9e0   :  { %2602 = vrsqrt.f32 %v767_v1  ;;  %v768_v8 = vadd.f32 1e-12, %v764_v7 }
 0x9e1   :  { %v762_v2 = vpop.xlane.xlu1 %761  ;;  %v759_v3 = vpop.xlane.xlu0 %758 }
 0x9e2   :  { %2604 = vrsqrt.f32 %v768_v8  ;;  %v766_v4 = vmul.f32 0.03125, %v762_v2  ;;  %v765_v5 = vmul.f32 0.03125, %v759_v3 }
 0x9e4   :  { %v770_v6 = vadd.f32 1e-12, %v766_v4  ;;  %v769_v9 = vadd.f32 1e-12, %v765_v5 }
 0x9e6   :  { %2606 = vrsqrt.f32 %v770_v6 }
 0x9e7   :  { %2608 = vrsqrt.f32 %v769_v9 }
 0x9ea   :  { %v2603_v10 = vpop.eup %2602 }
 0x9eb   :  { %v775_v12 = vmul.f32 %v2603_v10, %v743_v42 }
 0x9ec   :  { %v2605_v23 = vpop.eup %2604 }
 0x9ed   :  { %v776_v24 = vmul.f32 %v2605_v23, %v744_v44  ;;  %v785_v25 = vmul.f32 %v2192_v11, %v775_v12 }
 0x9ef   :  { %v786_v27 = vmul.f32 %v2192_v11, %v776_v24  ;;  %v2983_v31 = vadd.f32 %v2193_v26, %v785_v25 }
 0x9f0   :  { %v2607_v28 = vpop.eup %2606 }
 0x9f1   :  { %v2609_v29 = vpop.eup %2608  ;;  %v778_v30 = vmul.f32 %v2607_v28, %v746_v47  ;;  %v2985_v32 = vadd.f32 %v2193_v26, %v786_v27 }
 0x9f2   :  { %v777_v33 = vmul.f32 %v2609_v29, %v745_v50 }
 0x9f3   :  { %v788_v34 = vmul.f32 %v2192_v11, %v778_v30  ;;  %v799_v35 = vpack.c.bf16 %v2985_v32, %v2983_v31 }
 0x9f4   :  { %v787_v36 = vmul.f32 %v2192_v11, %v777_v33  ;;  %v2199_v33 = vld [vmem:[%s3274_s14] ss:$0 sm:$0xff] }
 0x9f5   :  { %2412 = vmatprep.mubr.msk.bf16.mxu0 %vm69_vm0, %v799_v35  ;;  %v2990_v37 = vadd.f32 %v2193_v26, %v788_v34 }
 0x9f6   :  { %v2992_v15 = vadd.f32 %v2193_v26, %v787_v36 }
 0x9f8   :  { %v800_v21 = vpack.c.bf16 %v2990_v37, %v2992_v15 }
 0x9fa   :  { %2413 = vmatmul.mubr.msk.bf16.vlgmr.msra.gmra.mrb[12].mxu0 %vm69_vm0, %v800_v21 }
 0x9fb   :  { %2417 = vmatpush3.bf16.msra.mxu0 %v2545_v14 }
 0x9fc   :  { %2418 = vmatprep.subr.bf16.mxu0 %v2546_v18 }
 0x9ff   :  { %2419 = vmatpush3.bf16.msra.mxu0 %v2546_v18 }
 0xa00   :  { %2420 = vmatprep.subr.bf16.mxu0 %v2547_v19 }
 0xa03   :  { %2421 = vmatpush3.bf16.msra.mxu0 %v2547_v19 }
 0xa04   :  { %2422 = vmatprep.subr.bf16.mxu0 %v2548_v22 }
 0xa07   :  { %2423 = vmatpush3.bf16.msra.mxu0 %v2548_v22 }
 0xacd   :  { %v2414_v39 = vpop.f32.mrb[12].mxu0 }
 0xace   :  { %v873_v40 = vadd.f32 %v2414_v39, %v2194_v38  ;;  %v864_v54 = vpop.f32.mrb[13].mxu0 }
 0xacf   :  { %v865_v41 = vadd.f32 %v2194_v38, %v864_v54  ;;  %v2415_v42 = vpop.f32.mrb[14].mxu0 }
 0xad0   :  { %v881_v43 = vmul.f32 %v873_v40, %v873_v40  ;;  %v876_v55 = vadd.f32 %v2415_v42, %v2194_v38  ;;  %v867_v44 = vpop.f32.mrb[15].mxu0 }
 0xad1   :  { %v879_v60 = vmul.f32 %v865_v41, %v865_v41  ;;  %v868_v45 = vadd.f32 %v2194_v38, %v867_v44 }
 0xad2   :  { %v885_v46 = vmul.f32 %v881_v43, %v873_v40  ;;  %v882_v47 = vmul.f32 %v876_v55, %v876_v55 }
 0xad3   :  { %v883_v48 = vmul.f32 %v879_v60, %v865_v41  ;;  %v880_v59 = vmul.f32 %v868_v45, %v868_v45 }
 0xad4   :  { %v889_v49 = vmul.f32 0.044715, %v885_v46  ;;  %v886_v50 = vmul.f32 %v882_v47, %v876_v55 }
 0xad5   :  { %v887_v51 = vmul.f32 0.044715, %v883_v48  ;;  %v884_v52 = vmul.f32 %v880_v59, %v868_v45 }
 0xad6   :  { %v893_v53 = vadd.f32 %v889_v49, %v873_v40  ;;  %v890_v56 = vmul.f32 0.044715, %v886_v50 }
 0xad7   :  { %v891_v57 = vadd.f32 %v887_v51, %v865_v41  ;;  %v888_v58 = vmul.f32 0.044715, %v884_v52 }
 0xad8   :  { %v897_v61 = vmul.f32 0.7978846, %v893_v53  ;;  %v894_v62 = vadd.f32 %v890_v56, %v876_v55 }
 0xad9   :  { %v895_v63 = vmul.f32 0.7978846, %v891_v57  ;;  %v892_v0 = vadd.f32 %v888_v58, %v868_v45 }
 0xada   :  { %2610 = vtanh.f32 %v897_v61  ;;  %v898_v1 = vmul.f32 0.7978846, %v894_v62  ;;  %v2549_v62 = vld [vmem:[%s3288_s26 + $0x10] sm:$0xff]  }
 0xadb   :  { %2612 = vtanh.f32 %v895_v63  ;;  %v896_v7 = vmul.f32 0.7978846, %v892_v0  ;;  %2428 = vmatprep.subr.bf16.mxu1 %v2549_v62  ;;  %v2550_v63 = vld [vmem:[%s3288_s26 + $0x18] sm:$0xff]  }
 0xadc   :  { %2614 = vtanh.f32 %v898_v1  ;;  %2429 = vmatpush3.bf16.msra.mxu1 %v2549_v62 }
 0xadd   :  { %2616 = vtanh.f32 %v896_v7  ;;  %2430 = vmatprep.subr.bf16.mxu1 %v2550_v63 }
 0xae0   :  { %2431 = vmatpush3.bf16.msra.mxu1 %v2550_v63 }
 0xae4   :  { %v2611_v8 = vpop.eup %2610 }
 0xae5   :  { %v2613_v2 = vpop.eup %2612  ;;  %v905_v3 = vadd.f32 1.0, %v2611_v8 }
 0xae6   :  { %v2615_v4 = vpop.eup %2614  ;;  %v903_v5 = vadd.f32 1.0, %v2613_v2 }
 0xae7   :  { %v2617_v6 = vpop.eup %2616  ;;  %v909_v9 = vmul.f32 0.5, %v905_v3  ;;  %v906_v10 = vadd.f32 1.0, %v2615_v4 }
 0xae8   :  { %v907_v11 = vmul.f32 0.5, %v903_v5  ;;  %v904_v12 = vadd.f32 1.0, %v2617_v6 }
 0xae9   :  { %v910_v23 = vmul.f32 0.5, %v906_v10  ;;  %v913_v25 = vmul.f32 %v909_v9, %v873_v40 }
 0xaea   :  { %v908_v24 = vmul.f32 0.5, %v904_v12  ;;  %v911_v27 = vmul.f32 %v907_v11, %v865_v41 }
 0xaeb   :  { %v914_v26 = vmul.f32 %v910_v23, %v876_v55  ;;  %v2206_v23 = vld [vmem:[%s3275_s15] ss:$0 sm:$0xff] }
 0xaec   :  { %v912_v28 = vmul.f32 %v908_v24, %v868_v45 }
 0xaed   :  { %v916_v29 = vpack.c.bf16 %v914_v26, %v913_v25 }
 0xaee   :  { %v915_v30 = vpack.c.bf16 %v912_v28, %v911_v27 }
 0xaf0   :  { %2424 = vmatprep.mubr.msk.bf16.mxu0 %vm956_vm2, %v915_v30 }
 0xaf1   :  { %2425 = vmatmul.mubr.msk.bf16.vlgmr.msra.gmra.mrb[16].mxu0 %vm956_vm2, %v916_v29  ;;  %v2207_v29 = vld [vmem:[%s3276_s16] ss:$0 sm:$0xff] }
 0xbc4   :  { %v2426_v34 = vpop.f32.mrb[16].mxu0 }
 0xbc5   :  { %v997_v35 = vpop.f32.mrb[17].mxu0  ;;  %v1006_v36 = vadd.f32 %v2426_v34, %v2199_v33 }
 0xbc6   :  { %v998_v21 = vadd.f32 %v2199_v33, %v997_v35  ;;  %v2427_v14 = vpop.f32.mrb[18].mxu0 }
 0xbc7   :  { %v1000_v18 = vpop.f32.mrb[19].mxu0  ;;  %v1009_v19 = vadd.f32 %v2427_v14, %v2199_v33  ;;  %v1014_v54 = vadd.f32 %v1006_v36, %v2992_v15 }
 0xbc8   :  { %v1001_v22 = vadd.f32 %v2199_v33, %v1000_v18  ;;  %v1012_v38 = vadd.f32 %v998_v21, %v2983_v31 }
 0xbc9   :  { %v1015_v42 = vadd.f32 %v1009_v19, %v2990_v37  ;;  %v1024_v43 = vsel %vm69_vm0, %v1014_v54, 0.0 }
 0xbca   :  { %v1018_v39 = vsel %vm69_vm0, %v1012_v38, 0.0  ;;  %v1013_v40 = vadd.f32 %v1001_v22, %v2985_v32 }
 0xbcb   :  { %1019 = vadd.xlane.f32.xlu0 %v1018_v39  ;;  %v1027_v55 = vsel %vm69_vm0, %v1015_v42, 0.0 }
 0xbcc   :  { %v1021_v41 = vsel %vm69_vm0, %v1013_v40, 0.0 }
 0xbcd   :  { %1022 = vadd.xlane.f32.xlu1 %v1021_v41 }
 0xbcf   :  { %1025 = vadd.xlane.f32.xlu0 %v1024_v43 }
 0xbd1   :  { %1028 = vadd.xlane.f32.xlu1 %v1027_v55 }
 0xc58   :  { %v1020_v44 = vpop.xlane.xlu0 %1019 }
 0xc59   :  { %v1030_v31 = vmul.f32 0.03125, %v1020_v44 }
 0xc5a   :  { %v1023_v60 = vpop.xlane.xlu1 %1022 }
 0xc5b   :  { %v1034_v45 = vsub.f32 %v1012_v38, %v1030_v31  ;;  %v1031_v46 = vmul.f32 0.03125, %v1023_v60 }
 0xc5c   :  { %v1026_v32 = vpop.xlane.xlu0 %1025 }
 0xc5d   :  { %v1035_v47 = vsub.f32 %v1013_v40, %v1031_v46  ;;  %v1032_v15 = vmul.f32 0.03125, %v1026_v32  ;;  %v1038_v48 = vmul.f32 %v1034_v45, %v1034_v45 }
 0xc5e   :  { %v1029_v59 = vpop.xlane.xlu1 %1028 }
 0xc5f   :  { %v1036_v49 = vsub.f32 %v1014_v54, %v1032_v15  ;;  %v1033_v50 = vmul.f32 0.03125, %v1029_v59  ;;  %v1042_v37 = vsel %vm69_vm0, %v1038_v48, 0.0  ;;  %v1039_v51 = vmul.f32 %v1035_v47, %v1035_v47  ;;  %v2213_v54 = vld [vmem:[%s3265_s6 + $0x1] ss:$0 sm:$0xff] }
 0xc60   :  { %1043 = vadd.xlane.f32.xlu0 %v1042_v37 }
 0xc61   :  { %v1037_v52 = vsub.f32 %v1015_v42, %v1033_v50  ;;  %v1045_v53 = vsel %vm69_vm0, %v1039_v51, 0.0  ;;  %v1040_v56 = vmul.f32 %v1036_v49, %v1036_v49 }
 0xc62   :  { %1046 = vadd.xlane.f32.xlu1 %v1045_v53 }
 0xc63   :  { %v1048_v57 = vsel %vm69_vm0, %v1040_v56, 0.0  ;;  %v1041_v58 = vmul.f32 %v1037_v52, %v1037_v52 }
 0xc64   :  { %1049 = vadd.xlane.f32.xlu0 %v1048_v57 }
 0xc65   :  { %v1051_v61 = vsel %vm69_vm0, %v1041_v58, 0.0 }
 0xc66   :  { %1052 = vadd.xlane.f32.xlu1 %v1051_v61 }
 0xced   :  { %v1044_v0 = vpop.xlane.xlu0 %1043 }
 0xcee   :  { %v1054_v1 = vmul.f32 0.03125, %v1044_v0 }
 0xcef   :  { %v1047_v7 = vpop.xlane.xlu1 %1046 }
 0xcf0   :  { %v1058_v8 = vadd.f32 1e-12, %v1054_v1  ;;  %v1055_v2 = vmul.f32 0.03125, %v1047_v7 }
 0xcf1   :  { %v1050_v3 = vpop.xlane.xlu0 %1049 }
 0xcf2   :  { %2618 = vrsqrt.f32 %v1058_v8  ;;  %v1059_v4 = vadd.f32 1e-12, %v1055_v2  ;;  %v1056_v5 = vmul.f32 0.03125, %v1050_v3 }
 0xcf3   :  { %v1053_v6 = vpop.xlane.xlu1 %1052 }
 0xcf4   :  { %2620 = vrsqrt.f32 %v1059_v4  ;;  %v1060_v9 = vadd.f32 1e-12, %v1056_v5  ;;  %v1057_v10 = vmul.f32 0.03125, %v1053_v6 }
 0xcf6   :  { %2622 = vrsqrt.f32 %v1060_v9  ;;  %v1061_v11 = vadd.f32 1e-12, %v1057_v10 }
 0xcf8   :  { %2624 = vrsqrt.f32 %v1061_v11 }
 0xcfc   :  { %v2619_v12 = vpop.eup %2618 }
 0xcfd   :  { %v1066_v24 = vmul.f32 %v2619_v12, %v1034_v45 }
 0xcfe   :  { %v2621_v25 = vpop.eup %2620 }
 0xcff   :  { %v1067_v26 = vmul.f32 %v2621_v25, %v1035_v47  ;;  %v1076_v27 = vmul.f32 %v2206_v23, %v1066_v24 }
 0xd00   :  { %v2623_v28 = vpop.eup %2622 }
 0xd01   :  { %v1068_v30 = vmul.f32 %v2623_v28, %v1036_v49  ;;  %v1077_v33 = vmul.f32 %v2206_v23, %v1067_v26  ;;  %v3041_v21 = vadd.f32 %v2207_v29, %v1076_v27 }
 0xd02   :  { %v2625_v34 = vpop.eup %2624 }
 0xd03   :  { %v1078_v35 = vmul.f32 %v2206_v23, %v1068_v30  ;;  %v1069_v36 = vmul.f32 %v2625_v34, %v1037_v52  ;;  %v3043_v14 = vadd.f32 %v2207_v29, %v1077_v33 }
 0xd05   :  { %v1079_v18 = vmul.f32 %v2206_v23, %v1069_v36  ;;  %v1090_v19 = vpack.c.bf16 %v3043_v14, %v3041_v21  ;;  %v3048_v22 = vadd.f32 %v2207_v29, %v1078_v35 }
 0xd07   :  { %2432 = vmatprep.mubr.msk.bf16.mxu1 %vm69_vm0, %v1090_v19  ;;  %v3050_v38 = vadd.f32 %v2207_v29, %v1079_v18 }
 0xd09   :  { %v1091_v39 = vpack.c.bf16 %v3050_v38, %v3048_v22 }
 0xd0b   :  { %2433 = vmatmul.mubr.msk.bf16.vlgmr.msra.gmra.mrb[12].mxu1 %vm69_vm0, %v1091_v39 }
 0xdde   :  { %v2434_v40 = vpop.f32.mrb[12].mxu1 }
 0xddf   :  { %v1157_v41 = vpop.f32.mrb[13].mxu1  ;;  %v1166_v43 = vadd.f32 %v2434_v40, %v2213_v54 }
 0xde0   :  { %v2435_v42 = vpop.f32.mrb[14].mxu1  ;;  %v1158_v31 = vadd.f32 %v2213_v54, %v1157_v41 }
 0xde1   :  { %v1169_v55 = vadd.f32 %v2435_v42, %v2213_v54  ;;  %v1160_v44 = vpop.f32.mrb[15].mxu1 }
 0xde2   :  { %v1161_v60 = vadd.f32 %v2213_v54, %v1160_v44 }
 0xde3   :  { %v3058_v45 = vpack.c.bf16 %v1169_v55, %v1166_v43 }
 0xde4   :  { %v3060_v46 = vpack.c.bf16 %v1161_v60, %v1158_v31 }
 0xde5   :  { %1183 = vrot.lane.b32.xlu1 %v3058_v45, %s2686_s23 }
 0xde6   :  { %1181 = vrot.lane.b32.xlu0 %v3060_v46, %s2686_s23  ;;  %2440 = vmatprep.mubr.msk.bf16.mxu1 %vm239_vm1, %v3060_v46 }
 0xe57   :  { %v1184_v15 = vpop.permute.xlu1 %1183 }
 0xe58   :  { %v1182_v32 = vpop.permute.xlu0 %1181  ;;  %v1195_v48 = vsel %vm239_vm1, %v1184_v15, 0 }
 0xe59   :  { %v1192_v47 = vsel %vm239_vm1, %v1182_v32, 0  ;;  %2528 = vmatprep.subr.msk.bf16.mxu1 %vm239_vm1, %v1182_v32 }
 0xe5a   :  { %2437 = vmatpush3.bf16.xpose.msra.mxu1 %v1192_v47 }
 0xe5b   :  { %2529 = vmatprep.subr.msk.bf16.mxu1 %vm239_vm1, %v1184_v15 }
 0xe62   :  { %2439 = vmatpush3.bf16.xpose.msra.mxu1 %v1195_v48 }
 0xe69   :  { %2441 = vmatmul.mubr.msk.bf16.vlgmr.msra.gmra.mrb[16].mxu1 %vm239_vm1, %v3058_v45 }
 0xf3c   :  { %v2442_v59 = vpop.f32.mrb[16].mxu1 }
 0xf3d   :  { %v1231_v49 = vpop.f32.mrb[17].mxu1  ;;  %v1240_v57 = vadd.f32 %v2442_v59, %v2877_v20 }
 0xf3e   :  { %v1232_v50 = vadd.f32 %v1231_v49, %v2861_v13  ;;  %v2443_v37 = vpop.f32.mrb[18].mxu1 }
 0xf3f   :  { %v1234_v51 = vpop.f32.mrb[19].mxu1  ;;  %v1243_v52 = vadd.f32 %v2443_v37, %v2866_v16  ;;  %v1252_v62 = vsel %vm69_vm0, %v1240_v57, -inf }
 0xf40   :  { %v1235_v53 = vadd.f32 %v1234_v51, %v2871_v17  ;;  %v1246_v56 = vsel %vm69_vm0, %v1232_v50, -inf  ;;  %v2682_v51 = vld [vmem:[%s3266_s1] sm:$0xff] }
 0xf41   :  { %1247 = vmax.xlane.f32.xlu1 %v1246_v56  ;;  %v1255_v61 = vsel %vm69_vm0, %v1243_v52, -inf }
 0xf42   :  { %v1249_v58 = vsel %vm69_vm0, %v1235_v53, -inf }
 0xf43   :  { %1250 = vmax.xlane.f32.xlu0 %v1249_v58 }
 0xf45   :  { %1256 = vmax.xlane.f32.xlu1 %v1255_v61  ;;  %v2684_v61 = vld [vmem:[%s3266_s1 + $0x8] sm:$0xff] }
 0xf47   :  { %1253 = vmax.xlane.f32.xlu0 %v1252_v62 }
 0xf56   :  { %1294 = vrot.lane.b32.xlu1 %v3058_v45, %s2687_s20 }
 0xfce   :  { %v1248_v13 = vpop.xlane.xlu1 %1247 }
 0xfcf   :  { %v1258_v0 = vsub.f32 %v1232_v50, %v1248_v13 }
 0xfd0   :  { %v1251_v16 = vpop.xlane.xlu0 %1250 }
 0xfd1   :  { %v1259_v17 = vsub.f32 %v1235_v53, %v1251_v16  ;;  %v1262_v3 = vmul.f32 1.442695, %v1258_v0 }
 0xfd2   :  { %v1257_v63 = vpop.xlane.xlu1 %1256 }
 0xfd3   :  { %v1261_v1 = vsub.f32 %v1243_v52, %v1257_v63  ;;  %v1264_v7 = vmul.f32 1.442695, %v1259_v17  ;;  %v2685_v17 = vld [vmem:[%s3266_s1 + $0x18] sm:$0xff] }
 0xfd4   :  { %v1254_v20 = vpop.xlane.xlu0 %1253 }
 0xfd5   :  { %v1268_v8 = vmul.f32 1.442695, %v1261_v1  ;;  %v1260_v2 = vsub.f32 %v1240_v57, %v1254_v20  ;;  %v2683_v57 = vld [vmem:[%s3266_s1 + $0x10] sm:$0xff] }
 0xfd6   :  { %v1295_v25 = vpop.permute.xlu1 %1294 }
 0xfd7   :  { %2626 = vpow2.f32 %v1268_v8  ;;  %v1266_v4 = vmul.f32 1.442695, %v1260_v2 }
 0xfd8   :  { %2628 = vpow2.f32 %v1264_v7 }
 0xfd9   :  { %2630 = vpow2.f32 %v1266_v4 }
 0xfda   :  { %2632 = vpow2.f32 %v1262_v3 }
 0xfe1   :  { %v2627_v5 = vpop.eup %2626 }
 0xfe2   :  { %v2629_v6 = vpop.eup %2628  ;;  %v1279_v9 = vsel %vm69_vm0, %v2627_v5, 0.0 }
 0xfe3   :  { %v2631_v10 = vpop.eup %2630  ;;  %1280 = vadd.xlane.f32.xlu1 %v1279_v9  ;;  %v1273_v23 = vsel %vm69_vm0, %v2629_v6, 0.0 }
 0xfe4   :  { %v1276_v11 = vsel %vm69_vm0, %v2631_v10, 0.0  ;;  %v2633_v12 = vpop.eup %2632 }
 0xfe5   :  { %1277 = vadd.xlane.f32.xlu0 %v1276_v11  ;;  %v1270_v24 = vsel %vm69_vm0, %v2633_v12, 0.0 }
 0xfe7   :  { %1274 = vadd.xlane.f32.xlu1 %v1273_v23 }
 0xfe9   :  { %1271 = vadd.xlane.f32.xlu0 %v1270_v24 }
 0xff8   :  { %1359 = vrot.lane.b32.xlu1 %v3060_v46, %s2688_s21 }
 0xffc   :  { %1361 = vrot.lane.b32.xlu1 %v3058_v45, %s2688_s21 }
 0xfff   :  { %1292 = vrot.lane.b32.xlu0 %v3060_v46, %s2687_s20 }
0x1000   :  { %1357 = vrot.lane.b32.xlu1 %v3058_v45, %s2689_s5 }
0x1003   :  { %1355 = vrot.lane.b32.xlu0 %v3060_v46, %s2689_s5 }
0x1070   :  { %v1281_v26 = vpop.xlane.xlu1 %1280 }
0x1072   :  { %v1278_v27 = vpop.xlane.xlu0 %1277 }
0x1073   :  { %2634 = vrcp.f32 %v1278_v27 }
0x1074   :  { %v1275_v28 = vpop.xlane.xlu1 %1274 }
0x1075   :  { %2636 = vrcp.f32 %v1275_v28 }
0x1076   :  { %2638 = vrcp.f32 %v1281_v26  ;;  %v1272_v29 = vpop.xlane.xlu0 %1271 }
0x1077   :  { %2640 = vrcp.f32 %v1272_v29 }
0x1078   :  { %v1360_v36 = vpop.permute.xlu1 %1359 }
0x1079   :  { %v1370_v55 = vsel %vm239_vm1, %v1360_v36, 0 }
0x107a   :  { %v1293_v30 = vpop.permute.xlu0 %1292 }
0x107b   :  { %2444 = vmatprep.subr.bf16.mxu0 %v1293_v30 }
0x107c   :  { %2445 = vmatpush3.bf16.msra.mxu0 %v1293_v30  ;;  %v1362_v44 = vpop.permute.xlu1 %1361 }
0x107d   :  { %2446 = vmatprep.subr.bf16.mxu0 %v1295_v25  ;;  %v2635_v33 = vpop.eup %2634  ;;  %v1373_v31 = vsel %vm239_vm1, %v1362_v44, 0 }
0x107e   :  { %v1288_v19 = vmul.f32 %v2635_v33, %v2631_v10  ;;  %v1356_v43 = vpop.permute.xlu0 %1355 }
0x107f   :  { %v2637_v34 = vpop.eup %2636 }
0x1080   :  { %v2639_v35 = vpop.eup %2638  ;;  %2447 = vmatpush3.bf16.msra.mxu0 %v1295_v25  ;;  %v1287_v40 = vmul.f32 %v2637_v34, %v2629_v6  ;;  %v1358_v60 = vpop.permute.xlu1 %1357 }
0x1081   :  { %v2641_v18 = vpop.eup %2640  ;;  %2530 = vmatprep.subr.msk.bf16.mxu0 %vm239_vm1, %v1360_v36  ;;  %v1289_v54 = vmul.f32 %v2639_v35, %v2627_v5 }
0x1082   :  { %v1286_v39 = vmul.f32 %v2641_v18, %v2633_v12 }
0x1083   :  { %v1291_v42 = vpack.c.bf16 %v1289_v54, %v1288_v19  ;;  %v2551_v19 = vld [vmem:[%s3267_s7 + $0x18] sm:$0xff]  }
0x1084   :  { %v1290_v41 = vpack.c.bf16 %v1287_v40, %v1286_v39 }
0x1086   :  { %2448 = vmatprep.mubr.msk.bf16.mxu0 %vm69_vm0, %v1290_v41 }
0x1087   :  { %2449 = vmatmul.mubr.msk.bf16.vlgmr.msra.gmra.mrb[20].mxu0 %vm69_vm0, %v1291_v42 }
0x1088   :  { %2456 = vmatprep.mubr.msk.bf16.mxu0 %vm239_vm1, %v1356_v43 }
0x1089   :  { %2453 = vmatpush3.bf16.xpose.msra.mxu0 %v1370_v55 }
0x108a   :  { %2531 = vmatprep.subr.msk.bf16.mxu0 %vm239_vm1, %v1362_v44 }
0x1091   :  { %2455 = vmatpush3.bf16.xpose.msra.mxu0 %v1373_v31 }
0x1098   :  { %2457 = vmatmul.mubr.msk.bf16.vlgmr.msra.gmra.mrb[24].mxu0 %vm239_vm1, %v1358_v60  ;;  %v2552_v60 = vld [vmem:[%s3267_s7 + $0x10] sm:$0xff]  }
0x115a   :  { %v3106_v32 = vpop.f32.mrb[20].mxu0 }
0x115b   :  { %v3108_v47 = vpop.f32.mrb[21].mxu0 }
0x115c   :  { %v3110_v15 = vpop.f32.mrb[22].mxu0 }
0x115d   :  { %v1354_v48 = vpack.c.bf16 %v3110_v15, %v3106_v32  ;;  %v3114_v59 = vpop.f32.mrb[23].mxu0 }
0x115e   :  { %v1353_v49 = vpack.c.bf16 %v3114_v59, %v3108_v47 }
0x116b   :  { %v2458_v50 = vpop.f32.mrb[24].mxu0 }
0x116c   :  { %v1409_v37 = vpop.f32.mrb[25].mxu0  ;;  %v1418_v58 = vadd.f32 %v2683_v57, %v2458_v50  ;;  %v2237_v57 = vld [vmem:[%s3268_s8 + $0x1] ss:$0 sm:$0xff] }
0x116d   :  { %v1410_v52 = vadd.f32 %v2682_v51, %v1409_v37  ;;  %v2459_v53 = vpop.f32.mrb[26].mxu0 }
0x116e   :  { %v1412_v56 = vpop.f32.mrb[27].mxu0  ;;  %v1421_v63 = vadd.f32 %v2685_v17, %v2459_v53  ;;  %v1430_v0 = vsel %vm69_vm0, %v1418_v58, -inf }
0x116f   :  { %v1413_v62 = vadd.f32 %v2684_v61, %v1412_v56  ;;  %v1424_v13 = vsel %vm69_vm0, %v1410_v52, -inf }
0x1170   :  { %1425 = vmax.xlane.f32.xlu0 %v1424_v13  ;;  %v1433_v1 = vsel %vm69_vm0, %v1421_v63, -inf }
0x1171   :  { %v1427_v16 = vsel %vm69_vm0, %v1413_v62, -inf }
0x1172   :  { %1428 = vmax.xlane.f32.xlu1 %v1427_v16 }
0x1174   :  { %1431 = vmax.xlane.f32.xlu0 %v1430_v0 }
0x1178   :  { %1434 = vmax.xlane.f32.xlu0 %v1433_v1 }
0x11fd   :  { %v1426_v7 = vpop.xlane.xlu0 %1425 }
0x11fe   :  { %v1436_v20 = vsub.f32 %v1410_v52, %v1426_v7 }
0x11ff   :  { %v1429_v8 = vpop.xlane.xlu1 %1428 }
0x1200   :  { %v1440_v4 = vmul.f32 1.442695, %v1436_v20  ;;  %v1437_v5 = vsub.f32 %v1413_v62, %v1429_v8 }
0x1201   :  { %v1432_v2 = vpop.xlane.xlu0 %1431 }
0x1202   :  { %v1438_v3 = vsub.f32 %v1418_v58, %v1432_v2  ;;  %v1442_v11 = vmul.f32 1.442695, %v1437_v5 }
0x1204   :  { %v1444_v6 = vmul.f32 1.442695, %v1438_v3 }
0x1205   :  { %v1435_v9 = vpop.xlane.xlu0 %1434 }
0x1206   :  { %2642 = vpow2.f32 %v1444_v6  ;;  %v1439_v10 = vsub.f32 %v1421_v63, %v1435_v9 }
0x1207   :  { %2644 = vpow2.f32 %v1440_v4 }
0x1208   :  { %v1446_v12 = vmul.f32 1.442695, %v1439_v10 }
0x120a   :  { %2646 = vpow2.f32 %v1446_v12 }
0x120b   :  { %2648 = vpow2.f32 %v1442_v11 }
0x1210   :  { %v2643_v23 = vpop.eup %2642 }
0x1211   :  { %v1454_v24 = vsel %vm69_vm0, %v2643_v23, 0.0  ;;  %v2645_v25 = vpop.eup %2644 }
0x1212   :  { %1455 = vadd.xlane.f32.xlu0 %v1454_v24  ;;  %v1448_v27 = vsel %vm69_vm0, %v2645_v25, 0.0 }
0x1214   :  { %v2647_v26 = vpop.eup %2646 }
0x1215   :  { %v1457_v28 = vsel %vm69_vm0, %v2647_v26, 0.0  ;;  %v2649_v29 = vpop.eup %2648 }
0x1216   :  { %1449 = vadd.xlane.f32.xlu0 %v1448_v27  ;;  %1458 = vadd.xlane.f32.xlu1 %v1457_v28  ;;  %v1451_v30 = vsel %vm69_vm0, %v2649_v29, 0.0  ;;  %v2553_v28 = vld [vmem:[%s3269_s11 + $0x10] sm:$0xff]  }
0x1217   :  { %2480 = vmatprep.subr.bf16.mxu0 %v2553_v28 }
0x1218   :  { %2481 = vmatpush3.bf16.msra.mxu0 %v2553_v28 }
0x121a   :  { %1452 = vadd.xlane.f32.xlu1 %v1451_v30 }
0x122b   :  { %1472 = vrot.lane.b32.xlu1 %v3058_v45, %s2690_s22 }
0x122c   :  { %1470 = vrot.lane.b32.xlu0 %v3060_v46, %s2690_s22 }
0x129f   :  { %v1456_v33 = vpop.xlane.xlu0 %1455 }
0x12a3   :  { %v1459_v34 = vpop.xlane.xlu1 %1458  ;;  %v1450_v35 = vpop.xlane.xlu0 %1449 }
0x12a4   :  { %2650 = vrcp.f32 %v1459_v34 }
0x12a5   :  { %2652 = vrcp.f32 %v1450_v35 }
0x12a6   :  { %2654 = vrcp.f32 %v1456_v33 }
0x12a7   :  { %v1453_v36 = vpop.xlane.xlu1 %1452  ;;  %v1471_v18 = vpop.permute.xlu0 %1470 }
0x12a8   :  { %2656 = vrcp.f32 %v1453_v36  ;;  %2460 = vmatprep.subr.bf16.mxu1 %v1471_v18 }
0x12a9   :  { %2461 = vmatpush3.bf16.msra.mxu1 %v1471_v18 }
0x12ab   :  { %v1473_v39 = vpop.permute.xlu1 %1472 }
0x12ac   :  { %2462 = vmatprep.subr.bf16.mxu1 %v1473_v39 }
0x12ad   :  { %2463 = vmatpush3.bf16.msra.mxu1 %v1473_v39 }
0x12ae   :  { %2468 = vmatprep.subr.bf16.mxu1 %v2551_v19  ;;  %v2651_v45 = vpop.eup %2650 }
0x12af   :  { %v2653_v46 = vpop.eup %2652  ;;  %v1467_v41 = vmul.f32 %v2651_v45, %v2647_v26 }
0x12b0   :  { %v2655_v40 = vpop.eup %2654  ;;  %v1464_v42 = vmul.f32 %v2653_v46, %v2645_v25 }
0x12b1   :  { %v1466_v55 = vmul.f32 %v2655_v40, %v2643_v23 }
0x12b2   :  { %v2657_v54 = vpop.eup %2656 }
0x12b3   :  { %v1465_v43 = vmul.f32 %v2657_v54, %v2649_v29  ;;  %v1469_v31 = vpack.c.bf16 %v1467_v41, %v1466_v55  ;;  %v2554_v29 = vld [vmem:[%s3269_s11 + $0x18] sm:$0xff]  }
0x12b4   :  { %2482 = vmatprep.subr.bf16.mxu0 %v2554_v29 }
0x12b5   :  { %v1468_v44 = vpack.c.bf16 %v1465_v43, %v1464_v42  ;;  %2483 = vmatpush3.bf16.msra.mxu0 %v2554_v29  ;;  %v2240_v42 = vld [vmem:[%s3270_s9 + $0x1] ss:$0 sm:$0xff] }
0x12b7   :  { %2464 = vmatprep.mubr.msk.bf16.mxu1 %vm69_vm0, %v1468_v44 }
0x12b8   :  { %2465 = vmatmul.mubr.msk.bf16.vlgmr.msra.gmra.mrb[20].mxu1 %vm69_vm0, %v1469_v31 }
0x12b9   :  { %2469 = vmatpush3.bf16.msra.mxu1 %v2551_v19 }
0x12ba   :  { %2474 = vmatprep.subr.bf16.mxu1 %v2552_v60 }
0x138b   :  { %v2466_v50 = vpop.f32.mrb[20].mxu1 }
0x138c   :  { %v1516_v37 = vpop.f32.mrb[21].mxu1 }
0x138d   :  { %v2467_v51 = vpop.f32.mrb[22].mxu1 }
0x138e   :  { %v1532_v52 = vpack.c.bf16 %v2467_v51, %v2466_v50  ;;  %v1519_v53 = vpop.f32.mrb[23].mxu1 }
0x138f   :  { %v1531_v56 = vpack.c.bf16 %v1519_v53, %v1516_v37 }
0x1391   :  { %2470 = vmatprep.mubr.msk.bf16.mxu1 %vm239_vm1, %v1531_v56 }
0x1392   :  { %2471 = vmatmul.mubr.msk.bf16.vlgmr.msra.gmra.mrb[24].mxu1 %vm239_vm1, %v1532_v52 }
0x1393   :  { %2475 = vmatpush3.bf16.msra.mxu1 %v2552_v60  ;;  %2476 = vmatprep.mubr.msk.bf16.mxu1 %vm239_vm1, %v1353_v49  ;;  %v2241_v60 = vld [vmem:[%s3271_s10 + $0x1] ss:$0 sm:$0xff] }
0x139e   :  { %2477 = vmatmul.mubr.msk.bf16.vlgmr.msra.gmra.mrb[24].mxu1 %vm239_vm1, %v1354_v48 }
0x1471   :  { %v2478_v58 = vpop.f32.mrb[24].mxu1 }
0x1472   :  { %v1640_v61 = vpop.f32.mrb[25].mxu1  ;;  %v1665_v63 = vadd.f32 %v2478_v58, %v2237_v57 }
0x1473   :  { %v1663_v62 = vadd.f32 %v2237_v57, %v1640_v61  ;;  %v2479_v13 = vpop.f32.mrb[26].mxu1 }
0x1474   :  { %v1666_v16 = vadd.f32 %v2479_v13, %v2237_v57  ;;  %v1643_v17 = vpop.f32.mrb[27].mxu1  ;;  %v1669_v49 = vadd.f32 %v1665_v63, %v3048_v22  ;;  %v2555_v63 = vld [vmem:[%s3272_s13 + $0x20] sm:$0xff]  }
0x1475   :  { %v1664_v0 = vadd.f32 %v2237_v57, %v1643_v17  ;;  %v1667_v47 = vadd.f32 %v1663_v62, %v3041_v21  ;;  %2488 = vmatprep.subr.bf16.mxu0 %v2555_v63 }
0x1476   :  { %v1670_v15 = vadd.f32 %v1666_v16, %v3050_v38  ;;  %v1681_v7 = vsel %vm69_vm0, %v1669_v49, 0.0 }
0x1477   :  { %v1675_v59 = vsel %vm69_vm0, %v1667_v47, 0.0  ;;  %v1668_v32 = vadd.f32 %v1664_v0, %v3043_v14  ;;  %v2556_v0 = vld [vmem:[%s3272_s13 + $0x28] sm:$0xff]  }
0x1478   :  { %1676 = vadd.xlane.f32.xlu1 %v1675_v59  ;;  %v1684_v1 = vsel %vm69_vm0, %v1670_v15, 0.0  ;;  %v2558_v59 = vld [vmem:[%s3272_s13 + $0x38] sm:$0xff]  }
0x1479   :  { %v1678_v48 = vsel %vm69_vm0, %v1668_v32, 0.0 }
0x147a   :  { %1679 = vadd.xlane.f32.xlu0 %v1678_v48 }
0x147c   :  { %1685 = vadd.xlane.f32.xlu1 %v1684_v1 }
0x147e   :  { %1682 = vadd.xlane.f32.xlu0 %v1681_v7 }
0x1505   :  { %v1677_v20 = vpop.xlane.xlu1 %1676 }
0x1506   :  { %v1687_v21 = vmul.f32 0.03125, %v1677_v20 }
0x1507   :  { %v1680_v8 = vpop.xlane.xlu0 %1679 }
0x1508   :  { %v1691_v2 = vsub.f32 %v1667_v47, %v1687_v21  ;;  %v1688_v3 = vmul.f32 0.03125, %v1680_v8  ;;  %v2557_v47 = vld [vmem:[%s3272_s13 + $0x30] sm:$0xff]  }
0x1509   :  { %v1686_v14 = vpop.xlane.xlu1 %1685 }
0x150a   :  { %v1692_v4 = vsub.f32 %v1668_v32, %v1688_v3  ;;  %v1690_v38 = vmul.f32 0.03125, %v1686_v14  ;;  %v1695_v5 = vmul.f32 %v1691_v2, %v1691_v2  ;;  %v2247_v32 = vld [vmem:[%s3273_s12 + $0x1] ss:$0 sm:$0xff] }
0x150b   :  { %v1683_v6 = vpop.xlane.xlu0 %1682 }
0x150c   :  { %v1694_v9 = vsub.f32 %v1670_v15, %v1690_v38  ;;  %v1689_v10 = vmul.f32 0.03125, %v1683_v6  ;;  %v1699_v22 = vsel %vm69_vm0, %v1695_v5, 0.0  ;;  %v1696_v11 = vmul.f32 %v1692_v4, %v1692_v4 }
0x150d   :  { %1700 = vadd.xlane.f32.xlu0 %v1699_v22 }
0x150e   :  { %v1693_v12 = vsub.f32 %v1669_v49, %v1689_v10  ;;  %v1702_v23 = vsel %vm69_vm0, %v1696_v11, 0.0  ;;  %v1698_v24 = vmul.f32 %v1694_v9, %v1694_v9 }
0x150f   :  { %1703 = vadd.xlane.f32.xlu1 %v1702_v23 }
0x1510   :  { %v1697_v25 = vmul.f32 %v1693_v12, %v1693_v12  ;;  %v1708_v26 = vsel %vm69_vm0, %v1698_v24, 0.0 }
0x1512   :  { %v1705_v27 = vsel %vm69_vm0, %v1697_v25, 0.0 }
0x1513   :  { %1709 = vadd.xlane.f32.xlu1 %v1708_v26  ;;  %1706 = vadd.xlane.f32.xlu0 %v1705_v27 }
0x159a   :  { %v1701_v30 = vpop.xlane.xlu0 %1700 }
0x159b   :  { %v1711_v33 = vmul.f32 0.03125, %v1701_v30 }
0x159c   :  { %v1704_v34 = vpop.xlane.xlu1 %1703 }
0x159d   :  { %v1715_v35 = vadd.f32 1e-12, %v1711_v33  ;;  %v1712_v36 = vmul.f32 0.03125, %v1704_v34 }
0x159f   :  { %2658 = vrsqrt.f32 %v1715_v35  ;;  %v1716_v18 = vadd.f32 1e-12, %v1712_v36 }
0x15a0   :  { %v1710_v19 = vpop.xlane.xlu1 %1709  ;;  %v1707_v39 = vpop.xlane.xlu0 %1706 }
0x15a1   :  { %2660 = vrsqrt.f32 %v1716_v18  ;;  %v1714_v45 = vmul.f32 0.03125, %v1710_v19  ;;  %v1713_v46 = vmul.f32 0.03125, %v1707_v39 }
0x15a3   :  { %v1718_v40 = vadd.f32 1e-12, %v1714_v45  ;;  %v1717_v54 = vadd.f32 1e-12, %v1713_v46 }
0x15a5   :  { %2662 = vrsqrt.f32 %v1718_v40 }
0x15a6   :  { %2664 = vrsqrt.f32 %v1717_v54 }
0x15a9   :  { %v2659_v41 = vpop.eup %2658 }
0x15aa   :  { %v1723_v43 = vmul.f32 %v2659_v41, %v1691_v2 }
0x15ab   :  { %v2661_v55 = vpop.eup %2660 }
0x15ac   :  { %v1724_v44 = vmul.f32 %v2661_v55, %v1692_v4  ;;  %v1733_v31 = vmul.f32 %v2240_v42, %v1723_v43 }
0x15ae   :  { %v1734_v50 = vmul.f32 %v2240_v42, %v1724_v44  ;;  %v3187_v53 = vadd.f32 %v2241_v60, %v1733_v31 }
0x15af   :  { %v2663_v37 = vpop.eup %2662 }
0x15b0   :  { %v2665_v51 = vpop.eup %2664  ;;  %v1726_v52 = vmul.f32 %v2663_v37, %v1694_v9  ;;  %v3189_v56 = vadd.f32 %v2241_v60, %v1734_v50  ;;  %v2261_v50 = vld [vmem:[%s3274_s14 + $0x1] ss:$0 sm:$0xff] }
0x15b1   :  { %v1725_v57 = vmul.f32 %v2665_v51, %v1693_v12 }
0x15b2   :  { %v1736_v58 = vmul.f32 %v2240_v42, %v1726_v52  ;;  %v1747_v61 = vpack.c.bf16 %v3189_v56, %v3187_v53 }
0x15b3   :  { %v1735_v62 = vmul.f32 %v2240_v42, %v1725_v57 }
0x15b4   :  { %2484 = vmatprep.mubr.msk.bf16.mxu0 %vm69_vm0, %v1747_v61  ;;  %v3194_v13 = vadd.f32 %v2241_v60, %v1736_v58 }
0x15b5   :  { %v3196_v16 = vadd.f32 %v2241_v60, %v1735_v62 }
0x15b7   :  { %v1748_v17 = vpack.c.bf16 %v3194_v13, %v3196_v16 }
0x15b9   :  { %2485 = vmatmul.mubr.msk.bf16.vlgmr.msra.gmra.mrb[28].mxu0 %vm69_vm0, %v1748_v17 }
0x15ba   :  { %2489 = vmatpush3.bf16.msra.mxu0 %v2555_v63 }
0x15bb   :  { %2490 = vmatprep.subr.bf16.mxu0 %v2556_v0 }
0x15be   :  { %2491 = vmatpush3.bf16.msra.mxu0 %v2556_v0 }
0x15bf   :  { %2492 = vmatprep.subr.bf16.mxu0 %v2557_v47 }
0x15c2   :  { %2493 = vmatpush3.bf16.msra.mxu0 %v2557_v47 }
0x15c3   :  { %2494 = vmatprep.subr.bf16.mxu0 %v2558_v59 }
0x15c6   :  { %2495 = vmatpush3.bf16.msra.mxu0 %v2558_v59 }
0x168c   :  { %v2486_v15 = vpop.f32.mrb[28].mxu0 }
0x168d   :  { %v1823_v48 = vadd.f32 %v2486_v15, %v2247_v32  ;;  %v1814_v49 = vpop.f32.mrb[29].mxu0 }
0x168e   :  { %v1815_v1 = vadd.f32 %v2247_v32, %v1814_v49  ;;  %v2487_v7 = vpop.f32.mrb[30].mxu0 }
0x168f   :  { %v1831_v20 = vmul.f32 %v1823_v48, %v1823_v48  ;;  %v1826_v21 = vadd.f32 %v2487_v7, %v2247_v32  ;;  %v1817_v8 = vpop.f32.mrb[31].mxu0 }
0x1690   :  { %v1829_v2 = vmul.f32 %v1815_v1, %v1815_v1  ;;  %v1818_v3 = vadd.f32 %v2247_v32, %v1817_v8 }
0x1691   :  { %v1835_v14 = vmul.f32 %v1831_v20, %v1823_v48  ;;  %v1832_v4 = vmul.f32 %v1826_v21, %v1826_v21 }
0x1692   :  { %v1833_v38 = vmul.f32 %v1829_v2, %v1815_v1  ;;  %v1830_v5 = vmul.f32 %v1818_v3, %v1818_v3 }
0x1693   :  { %v1839_v6 = vmul.f32 0.044715, %v1835_v14  ;;  %v1836_v9 = vmul.f32 %v1832_v4, %v1826_v21 }
0x1694   :  { %v1837_v10 = vmul.f32 0.044715, %v1833_v38  ;;  %v1834_v22 = vmul.f32 %v1830_v5, %v1818_v3 }
0x1695   :  { %v1843_v11 = vadd.f32 %v1839_v6, %v1823_v48  ;;  %v1840_v12 = vmul.f32 0.044715, %v1836_v9 }
0x1696   :  { %v1841_v23 = vadd.f32 %v1837_v10, %v1815_v1  ;;  %v1838_v24 = vmul.f32 0.044715, %v1834_v22 }
0x1697   :  { %v1847_v25 = vmul.f32 0.7978846, %v1843_v11  ;;  %v1844_v26 = vadd.f32 %v1840_v12, %v1826_v21  ;;  %v2691_v12 = vmov 0.0  }
0x1698   :  { %v1845_v27 = vmul.f32 0.7978846, %v1841_v23  ;;  %v1842_v28 = vadd.f32 %v1838_v24, %v1818_v3  ;;  %2500 = vmatprep.subr.bf16.mxu1 %v2691_v12  ;;  %2504 = vmatprep.mubr.msk.bf16.mxu1 %vm2692_vm3, %v2691_v12 }
0x1699   :  { %2666 = vtanh.f32 %v1847_v25  ;;  %v1848_v29 = vmul.f32 0.7978846, %v1844_v26 }
0x169a   :  { %2668 = vtanh.f32 %v1845_v27  ;;  %v1846_v30 = vmul.f32 0.7978846, %v1842_v28 }
0x169b   :  { %2670 = vtanh.f32 %v1848_v29 }
0x169c   :  { %2672 = vtanh.f32 %v1846_v30 }
0x16a3   :  { %v2667_v33 = vpop.eup %2666 }
0x16a4   :  { %v2669_v34 = vpop.eup %2668  ;;  %v1855_v35 = vadd.f32 1.0, %v2667_v33 }
0x16a5   :  { %v2671_v36 = vpop.eup %2670  ;;  %v1853_v18 = vadd.f32 1.0, %v2669_v34 }
0x16a6   :  { %v2673_v19 = vpop.eup %2672  ;;  %v1859_v39 = vmul.f32 0.5, %v1855_v35  ;;  %v1856_v45 = vadd.f32 1.0, %v2671_v36 }
0x16a7   :  { %v1857_v46 = vmul.f32 0.5, %v1853_v18  ;;  %v1854_v40 = vadd.f32 1.0, %v2673_v19  ;;  %v2270_v19 = vld [vmem:[%s3275_s15 + $0x1] ss:$0 sm:$0xff] }
0x16a8   :  { %v1860_v54 = vmul.f32 0.5, %v1856_v45  ;;  %v1863_v42 = vmul.f32 %v1859_v39, %v1823_v48 }
0x16a9   :  { %v1858_v41 = vmul.f32 0.5, %v1854_v40  ;;  %v1861_v55 = vmul.f32 %v1857_v46, %v1815_v1 }
0x16aa   :  { %v1864_v43 = vmul.f32 %v1860_v54, %v1826_v21 }
0x16ab   :  { %v1862_v44 = vmul.f32 %v1858_v41, %v1818_v3  ;;  %v2271_v41 = vld [vmem:[%s3276_s16 + $0x1] ss:$0 sm:$0xff] }
0x16ac   :  { %v1866_v31 = vpack.c.bf16 %v1864_v43, %v1863_v42 }
0x16ad   :  { %v1865_v60 = vpack.c.bf16 %v1862_v44, %v1861_v55 }
0x16af   :  { %2496 = vmatprep.mubr.msk.bf16.mxu0 %vm956_vm2, %v1865_v60 }
0x16b0   :  { %2497 = vmatmul.mubr.msk.bf16.vlgmr.msra.gmra.mrb[32].mxu0 %vm956_vm2, %v1866_v31 }
0x1783   :  { %v2498_v37 = vpop.f32.mrb[32].mxu0 }
0x1784   :  { %v1948_v51 = vpop.f32.mrb[33].mxu0  ;;  %v1957_v52 = vadd.f32 %v2498_v37, %v2261_v50 }
0x1785   :  { %v1949_v57 = vadd.f32 %v2261_v50, %v1948_v51  ;;  %v2499_v58 = vpop.f32.mrb[34].mxu0 }
0x1786   :  { %v1951_v61 = vpop.f32.mrb[35].mxu0  ;;  %v1960_v62 = vadd.f32 %v2499_v58, %v2261_v50  ;;  %v1965_v59 = vadd.f32 %v1957_v52, %v3196_v16 }
0x1787   :  { %v1952_v17 = vadd.f32 %v2261_v50, %v1951_v61  ;;  %v1963_v63 = vadd.f32 %v1949_v57, %v3187_v53  ;;  %v2559_v61 = vld [vmem:[%s3277_s2] sm:$0xff]  }
0x1788   :  { %v1966_v15 = vadd.f32 %v1960_v62, %v3194_v13  ;;  %v1977_v48 = vsel %vm69_vm0, %v1965_v59, 0.0  ;;  %v2560_v62 = vld [vmem:[%s3278_s17] sm:$0xff]  }
0x1789   :  { %v1971_v0 = vsel %vm69_vm0, %v1963_v63, 0.0  ;;  %v1964_v47 = vadd.f32 %v1952_v17, %v3189_v56  ;;  %v2561_v17 = vld [vmem:[%s3278_s17 + $0x8] sm:$0xff]  }
0x178a   :  { %1972 = vadd.xlane.f32.xlu0 %v1971_v0  ;;  %v1980_v49 = vsel %vm69_vm0, %v1966_v15, 0.0 }
0x178b   :  { %v1974_v32 = vsel %vm69_vm0, %v1964_v47, 0.0 }
0x178c   :  { %1975 = vadd.xlane.f32.xlu1 %v1974_v32 }
0x178e   :  { %1978 = vadd.xlane.f32.xlu0 %v1977_v48 }
0x1790   :  { %1981 = vadd.xlane.f32.xlu1 %v1980_v49 }
0x1817   :  { %v1973_v1 = vpop.xlane.xlu0 %1972 }
0x1818   :  { %v1983_v53 = vmul.f32 0.03125, %v1973_v1 }
0x1819   :  { %v1976_v7 = vpop.xlane.xlu1 %1975 }
0x181a   :  { %v1987_v20 = vsub.f32 %v1963_v63, %v1983_v53  ;;  %v1984_v21 = vmul.f32 0.03125, %v1976_v7 }
0x181b   :  { %v1979_v56 = vpop.xlane.xlu0 %1978 }
0x181c   :  { %v1988_v8 = vsub.f32 %v1964_v47, %v1984_v21  ;;  %v1985_v16 = vmul.f32 0.03125, %v1979_v56  ;;  %v1991_v2 = vmul.f32 %v1987_v20, %v1987_v20 }
0x181d   :  { %v1982_v3 = vpop.xlane.xlu1 %1981 }
0x181e   :  { %v1989_v14 = vsub.f32 %v1965_v59, %v1985_v16  ;;  %v1986_v4 = vmul.f32 0.03125, %v1982_v3  ;;  %v1995_v13 = vsel %vm69_vm0, %v1991_v2, 0.0  ;;  %v1992_v38 = vmul.f32 %v1988_v8, %v1988_v8 }
0x181f   :  { %1996 = vadd.xlane.f32.xlu0 %v1995_v13 }
0x1820   :  { %v1990_v5 = vsub.f32 %v1966_v15, %v1986_v4  ;;  %v1998_v6 = vsel %vm69_vm0, %v1992_v38, 0.0  ;;  %v1993_v9 = vmul.f32 %v1989_v14, %v1989_v14  ;;  %v2274_v15 = vld [vmem:[%s3279_s18] ss:$0 sm:$0xff] }
0x1821   :  { %1999 = vadd.xlane.f32.xlu1 %v1998_v6 }
0x1822   :  { %v2001_v10 = vsel %vm69_vm0, %v1993_v9, 0.0  ;;  %v1994_v22 = vmul.f32 %v1990_v5, %v1990_v5 }
0x1823   :  { %2002 = vadd.xlane.f32.xlu0 %v2001_v10 }
0x1824   :  { %v2004_v11 = vsel %vm69_vm0, %v1994_v22, 0.0 }
0x1825   :  { %2005 = vadd.xlane.f32.xlu1 %v2004_v11 }
0x18ac   :  { %v1997_v23 = vpop.xlane.xlu0 %1996 }
0x18ad   :  { %v2007_v24 = vmul.f32 0.03125, %v1997_v23 }
0x18ae   :  { %v2000_v25 = vpop.xlane.xlu1 %1999 }
0x18af   :  { %v2011_v26 = vadd.f32 1e-12, %v2007_v24  ;;  %v2008_v27 = vmul.f32 0.03125, %v2000_v25 }
0x18b0   :  { %v2003_v28 = vpop.xlane.xlu0 %2002 }
0x18b1   :  { %2674 = vrsqrt.f32 %v2011_v26  ;;  %v2012_v29 = vadd.f32 1e-12, %v2008_v27  ;;  %v2009_v30 = vmul.f32 0.03125, %v2003_v28 }
0x18b2   :  { %v2006_v33 = vpop.xlane.xlu1 %2005 }
0x18b3   :  { %2676 = vrsqrt.f32 %v2012_v29  ;;  %v2013_v34 = vadd.f32 1e-12, %v2009_v30  ;;  %v2010_v35 = vmul.f32 0.03125, %v2006_v33 }
0x18b5   :  { %2678 = vrsqrt.f32 %v2013_v34  ;;  %v2014_v36 = vadd.f32 1e-12, %v2010_v35 }
0x18b7   :  { %2680 = vrsqrt.f32 %v2014_v36 }
0x18bb   :  { %v2675_v18 = vpop.eup %2674 }
0x18bc   :  { %v2019_v39 = vmul.f32 %v2675_v18, %v1987_v20 }
0x18bd   :  { %v2677_v45 = vpop.eup %2676 }
0x18be   :  { %v2020_v46 = vmul.f32 %v2677_v45, %v1988_v8  ;;  %v2029_v40 = vmul.f32 %v2270_v19, %v2019_v39 }
0x18bf   :  { %v2679_v54 = vpop.eup %2678 }
0x18c0   :  { %v2021_v42 = vmul.f32 %v2679_v54, %v1989_v14  ;;  %v2030_v43 = vmul.f32 %v2270_v19, %v2020_v46  ;;  %v2039_v31 = vadd.f32 %v2271_v41, %v2029_v40 }
0x18c1   :  { %v2681_v55 = vpop.eup %2680 }
0x18c2   :  { %v2022_v44 = vmul.f32 %v2681_v55, %v1990_v5  ;;  %v2040_v60 = vadd.f32 %v2271_v41, %v2030_v43  ;;  %v2031_v50 = vmul.f32 %v2270_v19, %v2021_v42 }
0x18c4   :  { %v2045_v37 = vpack.c.bf16 %v2040_v60, %v2039_v31  ;;  %v2032_v51 = vmul.f32 %v2270_v19, %v2022_v44  ;;  %v2041_v52 = vadd.f32 %v2271_v41, %v2031_v50 }
0x18c6   :  { %2501 = vmatpush3.bf16.msra.mxu1 %v2045_v37  ;;  %v2042_v57 = vadd.f32 %v2271_v41, %v2032_v51 }
0x18c7   :  { %2502 = vmatprep.subr.bf16.mxu1 %v2691_v12 }
0x18c8   :  { %v2046_v58 = vpack.c.bf16 %v2042_v57, %v2041_v52 }
0x18ca   :  { %2503 = vmatpush3.bf16.msra.mxu1 %v2046_v58 }
0x18cb   :  { %2508 = vmatprep.subr.bf16.mxu1 %v2691_v12 }
0x18cd   :  { %2505 = vmatmul.mubr.msk.bf16.vlgmr.msra.gmra.mrb[28].mxu1 %vm69_vm0, %v2559_v61 }
0x18ce   :  { %2509 = vmatpush3.bf16.msra.mxu1 %v2560_v62  ;;  %2512 = vmatprep.mubr.msk.bf16.mxu1 %vm2692_vm3, %v2691_v12 }
0x18cf   :  { %2510 = vmatprep.subr.bf16.mxu1 %v2691_v12 }
0x18d2   :  { %2511 = vmatpush3.bf16.msra.mxu1 %v2561_v17 }
0x19a0   :  { %v2089_v63 = vpop.f32.mrb[28].mxu1 }
0x19a1   :  { %v2506_v0 = vpop.f32.mrb[29].mxu1 }
0x19a2   :  { %v2092_v47 = vpop.f32.mrb[30].mxu1 }
0x19a3   :  { %v2096_v59 = vpack.c.bf16 %v2092_v47, %v2089_v63  ;;  %v2507_v32 = vpop.f32.mrb[31].mxu1 }
0x19a5   :  { %2513 = vmatmul.mubr.msk.bf16.vlgmr.msra.gmra.mrb[32].mxu1 %vm69_vm0, %v2096_v59 }
0x1a78   :  { %v2157_v48 = vpop.f32.mrb[32].mxu1 }
0x1a79   :  { %v2158_v49 = vadd.f32 %v2274_v15, %v2157_v48  ;;  %v2514_v1 = vpop.f32.mrb[33].mxu1 }
0x1a7a   :  { %v2160_v53 = vpop.f32.mrb[34].mxu1 }
0x1a7b   :  { %2164 = vst [vmem:[%s3280_s19] sm:$0xff] %v2158_v49  ;;  %v2161_v7 = vadd.f32 %v2274_v15, %v2160_v53  ;;  %v2515_v20 = vpop.f32.mrb[35].mxu1 }
0x1a7d   :  { %2165 = vst [vmem:[%s3280_s19 + $0x8] sm:$0xff] %v2161_v7 }

</bundles_post_ra>
